<compile_context>
chip_gen: v7x
topology: tpu7x:2x2x1
jax: 0.10.0
libtpu: 0.0.40
codegen_flags: <defaults>
</compile_context>

<pallas_src>
import functools

import numpy as np
import jax
import jax.numpy as jnp
from jax import lax
from jax.experimental import pallas as pl
from jax.experimental.pallas import tpu as pltpu


# ------------------------------ fused kernel --------------------------------

def qnet_fused_kernel(
    xp_ref,                      # (N*Hp, Wp*Cin)  zero-padded input, row=n*Hp+hp, col=wp*Cin+ci
    bd1_ref, bc1_ref,            # (9*W*Cin, W*Ch1) stacked block-diag conv1 w ; (1, W*Ch1) tiled bias
    bd2_ref, bc2_ref,            # (9*W*Ch1, W*Ch2)                            ; (1, W*Ch2)
    wfc1_ref, bfc1_ref,          # (H*W*Ch2, 256) rows pre-permuted to (h,w,c) ; (1, 256)
    wfc2_ref, bfc2_ref,          # (256, 128) ; (1, 128)
    wfc3_ref, bfc3_ref,          # (128, 64)  ; (1, 64)
    wfc4_ref, bfc4_ref,          # (64, A)    ; (1, A)
    o_ref,                       # (N, A) softmax output
    y1p_ref,                     # scratch (N*Hp, Wp*Ch1): zero-padded conv1 output
    flat_ref,                    # scratch (N, H*W*Ch2):   flattened conv2 output
    *, n, h, w, cin, ch1, ch2,
):
    hp = h + 2
    rows = n * hp - 2            # rows of the shifted-window accumulators

    # -------- conv1 (3x3 SAME) as 9 accumulated shifted-window matmuls -------
    acc1 = None
    for k in range(9):
        dy, dx = k // 3, k % 3
        a = xp_ref[dy:dy + rows, dx * cin:dx * cin + w * cin]        # (rows, W*Cin)
        wk = bd1_ref[k * w * cin:(k + 1) * w * cin, :]               # (W*Cin, W*Ch1)
        d = jnp.dot(a, wk, preferred_element_type=jnp.float32)
        acc1 = d if acc1 is None else acc1 + d
    y1 = jnp.maximum(acc1 + bc1_ref[...], 0.0)                       # (rows, W*Ch1)

    # scatter valid rows into the zero-padded conv2 input (interior only)
    y1p_ref[...] = jnp.zeros_like(y1p_ref)
    for b in range(n):
        y1p_ref[b * hp + 1:b * hp + 1 + h, ch1:ch1 + w * ch1] = y1[b * hp:b * hp + h, :]

    # -------- conv2 (3x3 SAME), same scheme -----------------------------------
    acc2 = None
    for k in range(9):
        dy, dx = k // 3, k % 3
        a = y1p_ref[dy:dy + rows, dx * ch1:dx * ch1 + w * ch1]       # (rows, W*Ch1)
        wk = bd2_ref[k * w * ch1:(k + 1) * w * ch1, :]               # (W*Ch1, W*Ch2)
        d = jnp.dot(a, wk, preferred_element_type=jnp.float32)
        acc2 = d if acc2 is None else acc2 + d
    y2 = jnp.maximum(acc2 + bc2_ref[...], 0.0)                       # (rows, W*Ch2)

    # -------- flatten: (h, w, c) order; NCHW permutation folded into wfc1 -----
    for b in range(n):
        for hh in range(h):
            flat_ref[b:b + 1, hh * w * ch2:(hh + 1) * w * ch2] = \
                y2[b * hp + hh:b * hp + hh + 1, :]

    # -------- FC head + softmax ------------------------------------------------
    z = flat_ref[...]                                                # (N, H*W*Ch2)
    z = jnp.maximum(jnp.dot(z, wfc1_ref[...], preferred_element_type=jnp.float32)
                    + bfc1_ref[...], 0.0)
    z = jnp.maximum(jnp.dot(z, wfc2_ref[...], preferred_element_type=jnp.float32)
                    + bfc2_ref[...], 0.0)
    z = jnp.maximum(jnp.dot(z, wfc3_ref[...], preferred_element_type=jnp.float32)
                    + bfc3_ref[...], 0.0)
    logits = jnp.dot(z, wfc4_ref[...], preferred_element_type=jnp.float32) + bfc4_ref[...]
    m = jnp.max(logits, axis=1, keepdims=True)
    e = jnp.exp(logits - m)
    o_ref[...] = e / jnp.sum(e, axis=1, keepdims=True)


# --------------------------- one-time weight prep ----------------------------

def prepare_params(params, *, h, w):
    """Repack PyTorch-layout weights into kernel layouts (done ONCE, off hot path)."""
    cin = params["w_c1"].shape[2]
    ch2 = params["w_c2"].shape[3]
    eye_w = jnp.eye(w, dtype=jnp.float32)

    def blockdiag_stack(wc):
        # (3,3,ci,co) HWIO -> (9*W*ci, W*co); block k=(dy*3+dx) is kron(I_W, wc[dy,dx])
        blocks = [jnp.kron(eye_w, wc[dy, dx]) for dy in range(3) for dx in range(3)]
        return jnp.concatenate(blocks, axis=0)

    # fold nn.Flatten()'s NCHW (c,h,w) order into the fc1 rows: our flat column
    # order is (h, w, c)
    perm = np.empty(h * w * ch2, dtype=np.int32)
    for hh in range(h):
        for ww in range(w):
            for co in range(ch2):
                perm[hh * w * ch2 + ww * ch2 + co] = co * h * w + hh * w + ww

    return {
        "bd1": blockdiag_stack(params["w_c1"]),
        "bc1": jnp.tile(params["b_c1"], (1, w)),
        "bd2": blockdiag_stack(params["w_c2"]),
        "bc2": jnp.tile(params["b_c2"], (1, w)),
        "w_fc1": params["w_fc1"][perm, :], "b_fc1": params["b_fc1"],
        "w_fc2": params["w_fc2"], "b_fc2": params["b_fc2"],
        "w_fc3": params["w_fc3"], "b_fc3": params["b_fc3"],
        "w_fc4": params["w_fc4"], "b_fc4": params["b_fc4"],
        "_cin": cin,
    }


# --------------------------------- forward -----------------------------------

def qnet_forward(x_nchw, kp):
    """Qnet.forward as a single fused Pallas kernel call."""
    n, cin, h, w = x_nchw.shape
    hp, wp = h + 2, w + 2
    ch1 = kp["bc1"].shape[1] // w
    ch2 = kp["bc2"].shape[1] // w
    n_actions = kp["b_fc4"].shape[1]

    # tiny input re-layout: NCHW -> zero-padded (n*Hp+h, w*Cin+c) 2-D slab
    xp = jnp.transpose(x_nchw, (0, 2, 3, 1))
    xp = jnp.pad(xp, ((0, 0), (1, 1), (1, 1), (0, 0)))
    xp = xp.reshape(n * hp, wp * cin)

    kernel = functools.partial(qnet_fused_kernel,
                               n=n, h=h, w=w, cin=cin, ch1=ch1, ch2=ch2)
    vmem = pl.BlockSpec(memory_space=pltpu.MemorySpace.VMEM)
    return pl.pallas_call(
        kernel,
        out_shape=jax.ShapeDtypeStruct((n, n_actions), jnp.float32),
        in_specs=[vmem] * 13,
        out_specs=vmem,
        scratch_shapes=[
            pltpu.VMEM((n * hp, wp * ch1), jnp.float32),   # padded conv1 output
            pltpu.VMEM((n, h * w * ch2), jnp.float32),     # flattened conv2 output
        ],
    )(xp,
      kp["bd1"], kp["bc1"], kp["bd2"], kp["bc2"],
      kp["w_fc1"], kp["b_fc1"], kp["w_fc2"], kp["b_fc2"],
      kp["w_fc3"], kp["b_fc3"], kp["w_fc4"], kp["b_fc4"])


# ----------------------------- pure-JAX reference ----------------------------

def qnet_reference(x_nchw, params):
    x = jnp.transpose(x_nchw, (0, 2, 3, 1))
    dn = ("NHWC", "HWIO", "NHWC")
    y = lax.conv_general_dilated(x, params["w_c1"], (1, 1), "SAME", dimension_numbers=dn)
    y = jnp.maximum(y + params["b_c1"].reshape(1, 1, 1, -1), 0.0)
    y = lax.conv_general_dilated(y, params["w_c2"], (1, 1), "SAME", dimension_numbers=dn)
    y = jnp.maximum(y + params["b_c2"].reshape(1, 1, 1, -1), 0.0)
    n, h, w, c = y.shape
    flat = jnp.transpose(y, (0, 3, 1, 2)).reshape(n, c * h * w)
    z = jnp.maximum(flat @ params["w_fc1"] + params["b_fc1"], 0.0)
    z = jnp.maximum(z @ params["w_fc2"] + params["b_fc2"], 0.0)
    z = jnp.maximum(z @ params["w_fc3"] + params["b_fc3"], 0.0)
    logits = z @ params["w_fc4"] + params["b_fc4"]
    return jax.nn.softmax(logits, axis=1)


# -------------------------------- param init ---------------------------------

def _uniform(key, shape, fan_in):
    bound = 1.0 / float(np.sqrt(fan_in))
    return jax.random.uniform(key, shape, jnp.float32, -bound, bound)


def init_params(key, *, hidden_channels, state_dim, n_actions):
    layer2 = 64
    keys = jax.random.split(key, 12)
    return {
        # conv weights HWIO (3,3,Cin,Cout); biases (1,Cout)
        "w_c1": _uniform(keys[0], (3, 3, 2, hidden_channels), 2 * 9),
        "b_c1": _uniform(keys[1], (1, hidden_channels), 2 * 9),
        "w_c2": _uniform(keys[2], (3, 3, hidden_channels, layer2), hidden_channels * 9),
        "b_c2": _uniform(keys[3], (1, layer2), hidden_channels * 9),
        # linear weights (in, out); biases (1, out)
        "w_fc1": _uniform(keys[4], (layer2 * state_dim, 256), layer2 * state_dim),
        "b_fc1": _uniform(keys[5], (1, 256), layer2 * state_dim),
        "w_fc2": _uniform(keys[6], (256, 128), 256),
        "b_fc2": _uniform(keys[7], (1, 128), 256),
        "w_fc3": _uniform(keys[8], (128, 64), 128),
        "b_fc3": _uniform(keys[9], (1, 64), 128),
        "w_fc4": _uniform(keys[10], (64, n_actions), 64),
        "b_fc4": _uniform(keys[11], (1, n_actions), 64),
    }


# ----------------------------------- main -------------------------------------

if __name__ == "__main__":
    batch = 2
    in_channels = 2          # fixed by Qnet.__init__
    H = W = 4
    state_dim = H * W        # Linear(64 * state_dim, 256)
    hidden_channels = 8
    n_actions = 4

    key = jax.random.PRNGKey(0)
    kx, kpk = jax.random.split(key)
    x = jax.random.normal(kx, (batch, in_channels, H, W), jnp.float32)   # NCHW like PyTorch
    params = init_params(kpk, hidden_channels=hidden_channels,
                         state_dim=state_dim, n_actions=n_actions)

    kernel_params = prepare_params(params, h=H, w=W)   # one-time repack
    kernel_params.pop("_cin")

    out = jax.block_until_ready(jax.jit(qnet_forward)(x, kernel_params))
    ref = jax.block_until_ready(jax.jit(qnet_reference)(x, params))

    assert out.shape == (batch, n_actions), out.shape
    assert bool(jnp.allclose(jnp.sum(out, axis=1), 1.0, atol=1e-4))
    assert bool(jnp.allclose(out, ref, rtol=2e-2, atol=2e-2)), (out, ref)

    print("KERNEL_OK")
</pallas_src>

<mosaic_0001>
module attributes {stable_mosaic.version = 11 : i64} {
  func.func @qnet_fused_kernel(%arg0: memref<12x12xf32, #tpu.memory_space<vmem>>, %arg1: memref<72x32xf32, #tpu.memory_space<vmem>>, %arg2: memref<1x32xf32, #tpu.memory_space<vmem>>, %arg3: memref<288x256xf32, #tpu.memory_space<vmem>>, %arg4: memref<1x256xf32, #tpu.memory_space<vmem>>, %arg5: memref<1024x256xf32, #tpu.memory_space<vmem>>, %arg6: memref<1x256xf32, #tpu.memory_space<vmem>>, %arg7: memref<256x128xf32, #tpu.memory_space<vmem>>, %arg8: memref<1x128xf32, #tpu.memory_space<vmem>>, %arg9: memref<128x64xf32, #tpu.memory_space<vmem>>, %arg10: memref<1x64xf32, #tpu.memory_space<vmem>>, %arg11: memref<64x4xf32, #tpu.memory_space<vmem>>, %arg12: memref<1x4xf32, #tpu.memory_space<vmem>>, %arg13: memref<2x4xf32, #tpu.memory_space<vmem>>, %arg14: memref<12x48xf32, #tpu.memory_space<vmem>>, %arg15: memref<2x1024xf32, #tpu.memory_space<vmem>>) attributes {dimension_semantics = [], scalar_prefetch = 0 : i64, scratch_operands = 2 : i64, tpu.core_type = #tpu.core_type<tc>} {
    %c0 = arith.constant 0 : index
    %c0_0 = arith.constant 0 : index
    %0 = vector.load %arg0[%c0, %c0_0] : memref<12x12xf32, #tpu.memory_space<vmem>>, vector<10x8xf32>
    %c0_1 = arith.constant 0 : index
    %c0_2 = arith.constant 0 : index
    %1 = vector.load %arg1[%c0_1, %c0_2] : memref<72x32xf32, #tpu.memory_space<vmem>>, vector<8x32xf32>
    %cst = arith.constant dense<0.000000e+00> : vector<10x32xf32>
    %2 = tpu.matmul %0, %1, %cst {dimension_numbers = #tpu.dot_dimension_numbers<[1], [0], [0], [1], [0, 0, 1, 1], [], []>} : vector<10x8xf32>, vector<8x32xf32>, vector<10x32xf32> -> vector<10x32xf32>
    %c0_3 = arith.constant 0 : index
    %c2 = arith.constant 2 : index
    %3 = vector.load %arg0[%c0_3, %c2] : memref<12x12xf32, #tpu.memory_space<vmem>>, vector<10x8xf32>
    %c8 = arith.constant 8 : index
    %c0_4 = arith.constant 0 : index
    %4 = vector.load %arg1[%c8, %c0_4] : memref<72x32xf32, #tpu.memory_space<vmem>>, vector<8x32xf32>
    %cst_5 = arith.constant dense<0.000000e+00> : vector<10x32xf32>
    %5 = tpu.matmul %3, %4, %cst_5 {dimension_numbers = #tpu.dot_dimension_numbers<[1], [0], [0], [1], [0, 0, 1, 1], [], []>} : vector<10x8xf32>, vector<8x32xf32>, vector<10x32xf32> -> vector<10x32xf32>
    %6 = arith.addf %2, %5 : vector<10x32xf32>
    %c0_6 = arith.constant 0 : index
    %c4 = arith.constant 4 : index
    %7 = vector.load %arg0[%c0_6, %c4] : memref<12x12xf32, #tpu.memory_space<vmem>>, vector<10x8xf32>
    %c16 = arith.constant 16 : index
    %c0_7 = arith.constant 0 : index
    %8 = vector.load %arg1[%c16, %c0_7] : memref<72x32xf32, #tpu.memory_space<vmem>>, vector<8x32xf32>
    %cst_8 = arith.constant dense<0.000000e+00> : vector<10x32xf32>
    %9 = tpu.matmul %7, %8, %cst_8 {dimension_numbers = #tpu.dot_dimension_numbers<[1], [0], [0], [1], [0, 0, 1, 1], [], []>} : vector<10x8xf32>, vector<8x32xf32>, vector<10x32xf32> -> vector<10x32xf32>
    %10 = arith.addf %6, %9 : vector<10x32xf32>
    %c1 = arith.constant 1 : index
    %c0_9 = arith.constant 0 : index
    %11 = vector.load %arg0[%c1, %c0_9] : memref<12x12xf32, #tpu.memory_space<vmem>>, vector<10x8xf32>
    %c24 = arith.constant 24 : index
    %c0_10 = arith.constant 0 : index
    %12 = vector.load %arg1[%c24, %c0_10] : memref<72x32xf32, #tpu.memory_space<vmem>>, vector<8x32xf32>
    %cst_11 = arith.constant dense<0.000000e+00> : vector<10x32xf32>
    %13 = tpu.matmul %11, %12, %cst_11 {dimension_numbers = #tpu.dot_dimension_numbers<[1], [0], [0], [1], [0, 0, 1, 1], [], []>} : vector<10x8xf32>, vector<8x32xf32>, vector<10x32xf32> -> vector<10x32xf32>
    %14 = arith.addf %10, %13 : vector<10x32xf32>
    %c1_12 = arith.constant 1 : index
    %c2_13 = arith.constant 2 : index
    %15 = vector.load %arg0[%c1_12, %c2_13] : memref<12x12xf32, #tpu.memory_space<vmem>>, vector<10x8xf32>
    %c32 = arith.constant 32 : index
    %c0_14 = arith.constant 0 : index
    %16 = vector.load %arg1[%c32, %c0_14] : memref<72x32xf32, #tpu.memory_space<vmem>>, vector<8x32xf32>
    %cst_15 = arith.constant dense<0.000000e+00> : vector<10x32xf32>
    %17 = tpu.matmul %15, %16, %cst_15 {dimension_numbers = #tpu.dot_dimension_numbers<[1], [0], [0], [1], [0, 0, 1, 1], [], []>} : vector<10x8xf32>, vector<8x32xf32>, vector<10x32xf32> -> vector<10x32xf32>
    %18 = arith.addf %14, %17 : vector<10x32xf32>
    %c1_16 = arith.constant 1 : index
    %c4_17 = arith.constant 4 : index
    %19 = vector.load %arg0[%c1_16, %c4_17] : memref<12x12xf32, #tpu.memory_space<vmem>>, vector<10x8xf32>
    %c40 = arith.constant 40 : index
    %c0_18 = arith.constant 0 : index
    %20 = vector.load %arg1[%c40, %c0_18] : memref<72x32xf32, #tpu.memory_space<vmem>>, vector<8x32xf32>
    %cst_19 = arith.constant dense<0.000000e+00> : vector<10x32xf32>
    %21 = tpu.matmul %19, %20, %cst_19 {dimension_numbers = #tpu.dot_dimension_numbers<[1], [0], [0], [1], [0, 0, 1, 1], [], []>} : vector<10x8xf32>, vector<8x32xf32>, vector<10x32xf32> -> vector<10x32xf32>
    %22 = arith.addf %18, %21 : vector<10x32xf32>
    %c2_20 = arith.constant 2 : index
    %c0_21 = arith.constant 0 : index
    %23 = vector.load %arg0[%c2_20, %c0_21] : memref<12x12xf32, #tpu.memory_space<vmem>>, vector<10x8xf32>
    %c48 = arith.constant 48 : index
    %c0_22 = arith.constant 0 : index
    %24 = vector.load %arg1[%c48, %c0_22] : memref<72x32xf32, #tpu.memory_space<vmem>>, vector<8x32xf32>
    %cst_23 = arith.constant dense<0.000000e+00> : vector<10x32xf32>
    %25 = tpu.matmul %23, %24, %cst_23 {dimension_numbers = #tpu.dot_dimension_numbers<[1], [0], [0], [1], [0, 0, 1, 1], [], []>} : vector<10x8xf32>, vector<8x32xf32>, vector<10x32xf32> -> vector<10x32xf32>
    %26 = arith.addf %22, %25 : vector<10x32xf32>
    %c2_24 = arith.constant 2 : index
    %c2_25 = arith.constant 2 : index
    %27 = vector.load %arg0[%c2_24, %c2_25] : memref<12x12xf32, #tpu.memory_space<vmem>>, vector<10x8xf32>
    %c56 = arith.constant 56 : index
    %c0_26 = arith.constant 0 : index
    %28 = vector.load %arg1[%c56, %c0_26] : memref<72x32xf32, #tpu.memory_space<vmem>>, vector<8x32xf32>
    %cst_27 = arith.constant dense<0.000000e+00> : vector<10x32xf32>
    %29 = tpu.matmul %27, %28, %cst_27 {dimension_numbers = #tpu.dot_dimension_numbers<[1], [0], [0], [1], [0, 0, 1, 1], [], []>} : vector<10x8xf32>, vector<8x32xf32>, vector<10x32xf32> -> vector<10x32xf32>
    %30 = arith.addf %26, %29 : vector<10x32xf32>
    %c2_28 = arith.constant 2 : index
    %c4_29 = arith.constant 4 : index
    %31 = vector.load %arg0[%c2_28, %c4_29] : memref<12x12xf32, #tpu.memory_space<vmem>>, vector<10x8xf32>
    %c64 = arith.constant 64 : index
    %c0_30 = arith.constant 0 : index
    %32 = vector.load %arg1[%c64, %c0_30] : memref<72x32xf32, #tpu.memory_space<vmem>>, vector<8x32xf32>
    %cst_31 = arith.constant dense<0.000000e+00> : vector<10x32xf32>
    %33 = tpu.matmul %31, %32, %cst_31 {dimension_numbers = #tpu.dot_dimension_numbers<[1], [0], [0], [1], [0, 0, 1, 1], [], []>} : vector<10x8xf32>, vector<8x32xf32>, vector<10x32xf32> -> vector<10x32xf32>
    %34 = arith.addf %30, %33 : vector<10x32xf32>
    %c0_32 = arith.constant 0 : index
    %c0_33 = arith.constant 0 : index
    %35 = vector.load %arg2[%c0_32, %c0_33] : memref<1x32xf32, #tpu.memory_space<vmem>>, vector<1x32xf32>
    %36 = vector.broadcast %35 : vector<1x32xf32> to vector<10x32xf32>
    %37 = arith.addf %34, %36 : vector<10x32xf32>
    %cst_34 = arith.constant 0.000000e+00 : f32
    %38 = vector.broadcast %cst_34 : f32 to vector<10x32xf32>
    %39 = arith.maximumf %37, %38 : vector<10x32xf32>
    %cst_35 = arith.constant 0.000000e+00 : f32
    %40 = vector.broadcast %cst_35 : f32 to vector<12x48xf32>
    %c0_36 = arith.constant 0 : index
    %c0_37 = arith.constant 0 : index
    %41 = vector.load %arg14[%c0_36, %c0_37] : memref<12x48xf32, #tpu.memory_space<vmem>>, vector<12x48xf32>
    tpu.vector_store %arg14[%c0_36, %c0_37], %40 {strides = array<i32>} : memref<12x48xf32, #tpu.memory_space<vmem>>, vector<12x48xf32>,
    %42 = vector.extract_strided_slice %39 {offsets = [0, 0], sizes = [4, 32], strides = [1, 1]} : vector<10x32xf32> to vector<4x32xf32>
    %c1_38 = arith.constant 1 : index
    %c8_39 = arith.constant 8 : index
    %43 = vector.load %arg14[%c1_38, %c8_39] : memref<12x48xf32, #tpu.memory_space<vmem>>, vector<4x32xf32>
    tpu.vector_store %arg14[%c1_38, %c8_39], %42 {strides = array<i32>} : memref<12x48xf32, #tpu.memory_space<vmem>>, vector<4x32xf32>,
    %44 = vector.extract_strided_slice %39 {offsets = [6, 0], sizes = [4, 32], strides = [1, 1]} : vector<10x32xf32> to vector<4x32xf32>
    %c7 = arith.constant 7 : index
    %c8_40 = arith.constant 8 : index
    %45 = vector.load %arg14[%c7, %c8_40] : memref<12x48xf32, #tpu.memory_space<vmem>>, vector<4x32xf32>
    tpu.vector_store %arg14[%c7, %c8_40], %44 {strides = array<i32>} : memref<12x48xf32, #tpu.memory_space<vmem>>, vector<4x32xf32>,
    %c0_41 = arith.constant 0 : index
    %c0_42 = arith.constant 0 : index
    %46 = vector.load %arg14[%c0_41, %c0_42] : memref<12x48xf32, #tpu.memory_space<vmem>>, vector<10x32xf32>
    %c0_43 = arith.constant 0 : index
    %c0_44 = arith.constant 0 : index
    %47 = vector.load %arg3[%c0_43, %c0_44] : memref<288x256xf32, #tpu.memory_space<vmem>>, vector<32x256xf32>
    %cst_45 = arith.constant dense<0.000000e+00> : vector<10x256xf32>
    %48 = tpu.matmul %46, %47, %cst_45 {dimension_numbers = #tpu.dot_dimension_numbers<[1], [0], [0], [1], [0, 0, 1, 1], [], []>} : vector<10x32xf32>, vector<32x256xf32>, vector<10x256xf32> -> vector<10x256xf32>
    %c0_46 = arith.constant 0 : index
    %c8_47 = arith.constant 8 : index
    %49 = vector.load %arg14[%c0_46, %c8_47] : memref<12x48xf32, #tpu.memory_space<vmem>>, vector<10x32xf32>
    %c32_48 = arith.constant 32 : index
    %c0_49 = arith.constant 0 : index
    %50 = vector.load %arg3[%c32_48, %c0_49] : memref<288x256xf32, #tpu.memory_space<vmem>>, vector<32x256xf32>
    %cst_50 = arith.constant dense<0.000000e+00> : vector<10x256xf32>
    %51 = tpu.matmul %49, %50, %cst_50 {dimension_numbers = #tpu.dot_dimension_numbers<[1], [0], [0], [1], [0, 0, 1, 1], [], []>} : vector<10x32xf32>, vector<32x256xf32>, vector<10x256xf32> -> vector<10x256xf32>
    %52 = arith.addf %48, %51 : vector<10x256xf32>
    %c0_51 = arith.constant 0 : index
    %c16_52 = arith.constant 16 : index
    %53 = vector.load %arg14[%c0_51, %c16_52] : memref<12x48xf32, #tpu.memory_space<vmem>>, vector<10x32xf32>
    %c64_53 = arith.constant 64 : index
    %c0_54 = arith.constant 0 : index
    %54 = vector.load %arg3[%c64_53, %c0_54] : memref<288x256xf32, #tpu.memory_space<vmem>>, vector<32x256xf32>
    %cst_55 = arith.constant dense<0.000000e+00> : vector<10x256xf32>
    %55 = tpu.matmul %53, %54, %cst_55 {dimension_numbers = #tpu.dot_dimension_numbers<[1], [0], [0], [1], [0, 0, 1, 1], [], []>} : vector<10x32xf32>, vector<32x256xf32>, vector<10x256xf32> -> vector<10x256xf32>
    %56 = arith.addf %52, %55 : vector<10x256xf32>
    %c1_56 = arith.constant 1 : index
    %c0_57 = arith.constant 0 : index
    %57 = vector.load %arg14[%c1_56, %c0_57] : memref<12x48xf32, #tpu.memory_space<vmem>>, vector<10x32xf32>
    %c96 = arith.constant 96 : index
    %c0_58 = arith.constant 0 : index
    %58 = vector.load %arg3[%c96, %c0_58] : memref<288x256xf32, #tpu.memory_space<vmem>>, vector<32x256xf32>
    %cst_59 = arith.constant dense<0.000000e+00> : vector<10x256xf32>
    %59 = tpu.matmul %57, %58, %cst_59 {dimension_numbers = #tpu.dot_dimension_numbers<[1], [0], [0], [1], [0, 0, 1, 1], [], []>} : vector<10x32xf32>, vector<32x256xf32>, vector<10x256xf32> -> vector<10x256xf32>
    %60 = arith.addf %56, %59 : vector<10x256xf32>
    %c1_60 = arith.constant 1 : index
    %c8_61 = arith.constant 8 : index
    %61 = vector.load %arg14[%c1_60, %c8_61] : memref<12x48xf32, #tpu.memory_space<vmem>>, vector<10x32xf32>
    %c128 = arith.constant 128 : index
    %c0_62 = arith.constant 0 : index
    %62 = vector.load %arg3[%c128, %c0_62] : memref<288x256xf32, #tpu.memory_space<vmem>>, vector<32x256xf32>
    %cst_63 = arith.constant dense<0.000000e+00> : vector<10x256xf32>
    %63 = tpu.matmul %61, %62, %cst_63 {dimension_numbers = #tpu.dot_dimension_numbers<[1], [0], [0], [1], [0, 0, 1, 1], [], []>} : vector<10x32xf32>, vector<32x256xf32>, vector<10x256xf32> -> vector<10x256xf32>
    %64 = arith.addf %60, %63 : vector<10x256xf32>
    %c1_64 = arith.constant 1 : index
    %c16_65 = arith.constant 16 : index
    %65 = vector.load %arg14[%c1_64, %c16_65] : memref<12x48xf32, #tpu.memory_space<vmem>>, vector<10x32xf32>
    %c160 = arith.constant 160 : index
    %c0_66 = arith.constant 0 : index
    %66 = vector.load %arg3[%c160, %c0_66] : memref<288x256xf32, #tpu.memory_space<vmem>>, vector<32x256xf32>
    %cst_67 = arith.constant dense<0.000000e+00> : vector<10x256xf32>
    %67 = tpu.matmul %65, %66, %cst_67 {dimension_numbers = #tpu.dot_dimension_numbers<[1], [0], [0], [1], [0, 0, 1, 1], [], []>} : vector<10x32xf32>, vector<32x256xf32>, vector<10x256xf32> -> vector<10x256xf32>
    %68 = arith.addf %64, %67 : vector<10x256xf32>
    %c2_68 = arith.constant 2 : index
    %c0_69 = arith.constant 0 : index
    %69 = vector.load %arg14[%c2_68, %c0_69] : memref<12x48xf32, #tpu.memory_space<vmem>>, vector<10x32xf32>
    %c192 = arith.constant 192 : index
    %c0_70 = arith.constant 0 : index
    %70 = vector.load %arg3[%c192, %c0_70] : memref<288x256xf32, #tpu.memory_space<vmem>>, vector<32x256xf32>
    %cst_71 = arith.constant dense<0.000000e+00> : vector<10x256xf32>
    %71 = tpu.matmul %69, %70, %cst_71 {dimension_numbers = #tpu.dot_dimension_numbers<[1], [0], [0], [1], [0, 0, 1, 1], [], []>} : vector<10x32xf32>, vector<32x256xf32>, vector<10x256xf32> -> vector<10x256xf32>
    %72 = arith.addf %68, %71 : vector<10x256xf32>
    %c2_72 = arith.constant 2 : index
    %c8_73 = arith.constant 8 : index
    %73 = vector.load %arg14[%c2_72, %c8_73] : memref<12x48xf32, #tpu.memory_space<vmem>>, vector<10x32xf32>
    %c224 = arith.constant 224 : index
    %c0_74 = arith.constant 0 : index
    %74 = vector.load %arg3[%c224, %c0_74] : memref<288x256xf32, #tpu.memory_space<vmem>>, vector<32x256xf32>
    %cst_75 = arith.constant dense<0.000000e+00> : vector<10x256xf32>
    %75 = tpu.matmul %73, %74, %cst_75 {dimension_numbers = #tpu.dot_dimension_numbers<[1], [0], [0], [1], [0, 0, 1, 1], [], []>} : vector<10x32xf32>, vector<32x256xf32>, vector<10x256xf32> -> vector<10x256xf32>
    %76 = arith.addf %72, %75 : vector<10x256xf32>
    %c2_76 = arith.constant 2 : index
    %c16_77 = arith.constant 16 : index
    %77 = vector.load %arg14[%c2_76, %c16_77] : memref<12x48xf32, #tpu.memory_space<vmem>>, vector<10x32xf32>
    %c256 = arith.constant 256 : index
    %c0_78 = arith.constant 0 : index
    %78 = vector.load %arg3[%c256, %c0_78] : memref<288x256xf32, #tpu.memory_space<vmem>>, vector<32x256xf32>
    %cst_79 = arith.constant dense<0.000000e+00> : vector<10x256xf32>
    %79 = tpu.matmul %77, %78, %cst_79 {dimension_numbers = #tpu.dot_dimension_numbers<[1], [0], [0], [1], [0, 0, 1, 1], [], []>} : vector<10x32xf32>, vector<32x256xf32>, vector<10x256xf32> -> vector<10x256xf32>
    %80 = arith.addf %76, %79 : vector<10x256xf32>
    %c0_80 = arith.constant 0 : index
    %c0_81 = arith.constant 0 : index
    %81 = vector.load %arg4[%c0_80, %c0_81] : memref<1x256xf32, #tpu.memory_space<vmem>>, vector<1x256xf32>
    %82 = vector.broadcast %81 : vector<1x256xf32> to vector<10x256xf32>
    %83 = arith.addf %80, %82 : vector<10x256xf32>
    %cst_82 = arith.constant 0.000000e+00 : f32
    %84 = vector.broadcast %cst_82 : f32 to vector<10x256xf32>
    %85 = arith.maximumf %83, %84 : vector<10x256xf32>
    %86 = vector.extract_strided_slice %85 {offsets = [0, 0], sizes = [1, 256], strides = [1, 1]} : vector<10x256xf32> to vector<1x256xf32>
    %c0_83 = arith.constant 0 : index
    %c0_84 = arith.constant 0 : index
    %87 = vector.load %arg15[%c0_83, %c0_84] : memref<2x1024xf32, #tpu.memory_space<vmem>>, vector<1x256xf32>
    tpu.vector_store %arg15[%c0_83, %c0_84], %86 {strides = array<i32>} : memref<2x1024xf32, #tpu.memory_space<vmem>>, vector<1x256xf32>,
    %88 = vector.extract_strided_slice %85 {offsets = [1, 0], sizes = [1, 256], strides = [1, 1]} : vector<10x256xf32> to vector<1x256xf32>
    %c0_85 = arith.constant 0 : index
    %c256_86 = arith.constant 256 : index
    %89 = vector.load %arg15[%c0_85, %c256_86] : memref<2x1024xf32, #tpu.memory_space<vmem>>, vector<1x256xf32>
    tpu.vector_store %arg15[%c0_85, %c256_86], %88 {strides = array<i32>} : memref<2x1024xf32, #tpu.memory_space<vmem>>, vector<1x256xf32>,
    %90 = vector.extract_strided_slice %85 {offsets = [2, 0], sizes = [1, 256], strides = [1, 1]} : vector<10x256xf32> to vector<1x256xf32>
    %c0_87 = arith.constant 0 : index
    %c512 = arith.constant 512 : index
    %91 = vector.load %arg15[%c0_87, %c512] : memref<2x1024xf32, #tpu.memory_space<vmem>>, vector<1x256xf32>
    tpu.vector_store %arg15[%c0_87, %c512], %90 {strides = array<i32>} : memref<2x1024xf32, #tpu.memory_space<vmem>>, vector<1x256xf32>,
    %92 = vector.extract_strided_slice %85 {offsets = [3, 0], sizes = [1, 256], strides = [1, 1]} : vector<10x256xf32> to vector<1x256xf32>
    %c0_88 = arith.constant 0 : index
    %c768 = arith.constant 768 : index
    %93 = vector.load %arg15[%c0_88, %c768] : memref<2x1024xf32, #tpu.memory_space<vmem>>, vector<1x256xf32>
    tpu.vector_store %arg15[%c0_88, %c768], %92 {strides = array<i32>} : memref<2x1024xf32, #tpu.memory_space<vmem>>, vector<1x256xf32>,
    %94 = vector.extract_strided_slice %85 {offsets = [6, 0], sizes = [1, 256], strides = [1, 1]} : vector<10x256xf32> to vector<1x256xf32>
    %c1_89 = arith.constant 1 : index
    %c0_90 = arith.constant 0 : index
    %95 = vector.load %arg15[%c1_89, %c0_90] : memref<2x1024xf32, #tpu.memory_space<vmem>>, vector<1x256xf32>
    tpu.vector_store %arg15[%c1_89, %c0_90], %94 {strides = array<i32>} : memref<2x1024xf32, #tpu.memory_space<vmem>>, vector<1x256xf32>,
    %96 = vector.extract_strided_slice %85 {offsets = [7, 0], sizes = [1, 256], strides = [1, 1]} : vector<10x256xf32> to vector<1x256xf32>
    %c1_91 = arith.constant 1 : index
    %c256_92 = arith.constant 256 : index
    %97 = vector.load %arg15[%c1_91, %c256_92] : memref<2x1024xf32, #tpu.memory_space<vmem>>, vector<1x256xf32>
    tpu.vector_store %arg15[%c1_91, %c256_92], %96 {strides = array<i32>} : memref<2x1024xf32, #tpu.memory_space<vmem>>, vector<1x256xf32>,
    %98 = vector.extract_strided_slice %85 {offsets = [8, 0], sizes = [1, 256], strides = [1, 1]} : vector<10x256xf32> to vector<1x256xf32>
    %c1_93 = arith.constant 1 : index
    %c512_94 = arith.constant 512 : index
    %99 = vector.load %arg15[%c1_93, %c512_94] : memref<2x1024xf32, #tpu.memory_space<vmem>>, vector<1x256xf32>
    tpu.vector_store %arg15[%c1_93, %c512_94], %98 {strides = array<i32>} : memref<2x1024xf32, #tpu.memory_space<vmem>>, vector<1x256xf32>,
    %100 = vector.extract_strided_slice %85 {offsets = [9, 0], sizes = [1, 256], strides = [1, 1]} : vector<10x256xf32> to vector<1x256xf32>
    %c1_95 = arith.constant 1 : index
    %c768_96 = arith.constant 768 : index
    %101 = vector.load %arg15[%c1_95, %c768_96] : memref<2x1024xf32, #tpu.memory_space<vmem>>, vector<1x256xf32>
    tpu.vector_store %arg15[%c1_95, %c768_96], %100 {strides = array<i32>} : memref<2x1024xf32, #tpu.memory_space<vmem>>, vector<1x256xf32>,
    %c0_97 = arith.constant 0 : index
    %c0_98 = arith.constant 0 : index
    %102 = vector.load %arg15[%c0_97, %c0_98] : memref<2x1024xf32, #tpu.memory_space<vmem>>, vector<2x1024xf32>
    %c0_99 = arith.constant 0 : index
    %c0_100 = arith.constant 0 : index
    %103 = vector.load %arg5[%c0_99, %c0_100] : memref<1024x256xf32, #tpu.memory_space<vmem>>, vector<1024x256xf32>
    %cst_101 = arith.constant dense<0.000000e+00> : vector<2x256xf32>
    %104 = tpu.matmul %102, %103, %cst_101 {dimension_numbers = #tpu.dot_dimension_numbers<[1], [0], [0], [1], [0, 0, 1, 1], [], []>} : vector<2x1024xf32>, vector<1024x256xf32>, vector<2x256xf32> -> vector<2x256xf32>
    %c0_102 = arith.constant 0 : index
    %c0_103 = arith.constant 0 : index
    %105 = vector.load %arg6[%c0_102, %c0_103] : memref<1x256xf32, #tpu.memory_space<vmem>>, vector<1x256xf32>
    %106 = vector.broadcast %105 : vector<1x256xf32> to vector<2x256xf32>
    %107 = arith.addf %104, %106 : vector<2x256xf32>
    %cst_104 = arith.constant 0.000000e+00 : f32
    %108 = vector.broadcast %cst_104 : f32 to vector<2x256xf32>
    %109 = arith.maximumf %107, %108 : vector<2x256xf32>
    %c0_105 = arith.constant 0 : index
    %c0_106 = arith.constant 0 : index
    %110 = vector.load %arg7[%c0_105, %c0_106] : memref<256x128xf32, #tpu.memory_space<vmem>>, vector<256x128xf32>
    %cst_107 = arith.constant dense<0.000000e+00> : vector<2x128xf32>
    %111 = tpu.matmul %109, %110, %cst_107 {dimension_numbers = #tpu.dot_dimension_numbers<[1], [0], [0], [1], [0, 0, 1, 1], [], []>} : vector<2x256xf32>, vector<256x128xf32>, vector<2x128xf32> -> vector<2x128xf32>
    %c0_108 = arith.constant 0 : index
    %c0_109 = arith.constant 0 : index
    %112 = vector.load %arg8[%c0_108, %c0_109] : memref<1x128xf32, #tpu.memory_space<vmem>>, vector<1x128xf32>
    %113 = vector.broadcast %112 : vector<1x128xf32> to vector<2x128xf32>
    %114 = arith.addf %111, %113 : vector<2x128xf32>
    %cst_110 = arith.constant 0.000000e+00 : f32
    %115 = vector.broadcast %cst_110 : f32 to vector<2x128xf32>
    %116 = arith.maximumf %114, %115 : vector<2x128xf32>
    %c0_111 = arith.constant 0 : index
    %c0_112 = arith.constant 0 : index
    %117 = vector.load %arg9[%c0_111, %c0_112] : memref<128x64xf32, #tpu.memory_space<vmem>>, vector<128x64xf32>
    %cst_113 = arith.constant dense<0.000000e+00> : vector<2x64xf32>
    %118 = tpu.matmul %116, %117, %cst_113 {dimension_numbers = #tpu.dot_dimension_numbers<[1], [0], [0], [1], [0, 0, 1, 1], [], []>} : vector<2x128xf32>, vector<128x64xf32>, vector<2x64xf32> -> vector<2x64xf32>
    %c0_114 = arith.constant 0 : index
    %c0_115 = arith.constant 0 : index
    %119 = vector.load %arg10[%c0_114, %c0_115] : memref<1x64xf32, #tpu.memory_space<vmem>>, vector<1x64xf32>
    %120 = vector.broadcast %119 : vector<1x64xf32> to vector<2x64xf32>
    %121 = arith.addf %118, %120 : vector<2x64xf32>
    %cst_116 = arith.constant 0.000000e+00 : f32
    %122 = vector.broadcast %cst_116 : f32 to vector<2x64xf32>
    %123 = arith.maximumf %121, %122 : vector<2x64xf32>
    %c0_117 = arith.constant 0 : index
    %c0_118 = arith.constant 0 : index
    %124 = vector.load %arg11[%c0_117, %c0_118] : memref<64x4xf32, #tpu.memory_space<vmem>>, vector<64x4xf32>
    %cst_119 = arith.constant dense<0.000000e+00> : vector<2x4xf32>
    %125 = tpu.matmul %123, %124, %cst_119 {dimension_numbers = #tpu.dot_dimension_numbers<[1], [0], [0], [1], [0, 0, 1, 1], [], []>} : vector<2x64xf32>, vector<64x4xf32>, vector<2x4xf32> -> vector<2x4xf32>
    %c0_120 = arith.constant 0 : index
    %c0_121 = arith.constant 0 : index
    %126 = vector.load %arg12[%c0_120, %c0_121] : memref<1x4xf32, #tpu.memory_space<vmem>>, vector<1x4xf32>
    %127 = vector.broadcast %126 : vector<1x4xf32> to vector<2x4xf32>
    %128 = arith.addf %125, %127 : vector<2x4xf32>
    %cst_122 = arith.constant dense<0xFF800000> : vector<2xf32>
    %129 = vector.multi_reduction <maximumf>, %128, %cst_122 [1] : vector<2x4xf32> to vector<2xf32>
    %130 = vector.shape_cast %129 : vector<2xf32> to vector<2x1xf32>
    %131 = vector.broadcast %130 : vector<2x1xf32> to vector<2x4xf32>
    %132 = arith.subf %128, %131 : vector<2x4xf32>
    %133 = math.exp %132 : vector<2x4xf32>
    %cst_123 = arith.constant dense<0.000000e+00> : vector<2xf32>
    %134 = vector.multi_reduction <add>, %133, %cst_123 [1] : vector<2x4xf32> to vector<2xf32>
    %135 = vector.shape_cast %134 : vector<2xf32> to vector<2x1xf32>
    %136 = vector.broadcast %135 : vector<2x1xf32> to vector<2x4xf32>
    %137 = arith.divf %133, %136 : vector<2x4xf32>
    %c0_124 = arith.constant 0 : index
    %c0_125 = arith.constant 0 : index
    %138 = vector.load %arg13[%c0_124, %c0_125] : memref<2x4xf32, #tpu.memory_space<vmem>>, vector<2x4xf32>
    tpu.vector_store %arg13[%c0_124, %c0_125], %137 {strides = array<i32>} : memref<2x4xf32, #tpu.memory_space<vmem>>, vector<2x4xf32>,
    return
  }
}

</mosaic_0001>

<bundles_post_ra>
// kernel: qnet_forward.1
= control target key start
LH: loop header
LB: loop body
LE: loop exit
PB: predicated region body
PF: predicated region fallthrough
CT: control target
= control target key end

     0   :  { %18 = vsyncpa [#allocation5], 0  ;;  %s4070_s0 = inlined_call_operand.vmem [shape: f32[12,12], index: 0, kind: input, shape index: {}]   ;;  %s4071_s1 = inlined_call_operand.vmem [shape: f32[72,32], index: 1, kind: input, shape index: {}]   ;;  %s4072_s2 = inlined_call_operand.vmem [shape: f32[1,32], index: 2, kind: input, shape index: {}]   ;;  %s4073_s3 = inlined_call_operand.hbm [shape: f32[288,256], index: 3, kind: input, shape index: {}]   ;;  %s4074_s4 = inlined_call_operand.vmem [shape: f32[1,256], index: 4, kind: input, shape index: {}]   ;;  %s4075_s5 = inlined_call_operand.hbm [shape: f32[1024,256], index: 5, kind: input, shape index: {}]   ;;  %s4076_s6 = inlined_call_operand.vmem [shape: f32[1,256], index: 6, kind: input, shape index: {}]   ;;  %s4077_s7 = inlined_call_operand.vmem [shape: f32[256,128], index: 7, kind: input, shape index: {}]   ;;  %s4078_s8 = inlined_call_operand.vmem [shape: f32[1,128], index: 8, kind: input, shape index: {}]   ;;  %s4079_s9 = inlined_call_operand.vmem [shape: f32[128,64], index: 9, kind: input, shape index: {}]   ;;  %s4080_s10 = inlined_call_operand.vmem [shape: f32[1,64], index: 10, kind: input, shape index: {}]   ;;  %s4081_s11 = inlined_call_operand.vmem [shape: f32[64,4], index: 11, kind: input, shape index: {}]   ;;  %s4082_s12 = inlined_call_operand.vmem [shape: f32[1,4], index: 12, kind: input, shape index: {}]   ;;  %s4083_s13 = inlined_call_operand.hbm [shape: f32[2,4], index: 13, kind: output, shape index: {}]  }
   0x1   :  { %19 = vsyncpa [#allocation8], 0 }
   0x2   :  { %20 = vsyncpa [#allocation6], 0  ;;  %s3558_s25 = smov [#allocation4]   ;;  %s3486_s29 = scalar_lea.hbm %s4073_s3, 9216 }
   0x3   :  { %s32_s26 = sshll.u32 %s3558_s25, 4  ;;  %p3487_p0 = scmp.ne.s32.totalorder %s4073_s3, %s3486_s29  ;;  %s33_s26 = int_to_ptr.vmem [resolvable:$true] %s32_s26 }
   0x4   :  { %p3490_p1 = scmp.lt.u32.totalorder %s3486_s29, %s4073_s3 }
   0x6   :  { %p3492_p2 = pnand %p3490_p1, %p3487_p0 }
   0x8   :  { %3495 = shalt.err (!%p3492_p2)
}
   0x9   :  { %s3496_s17 = scalar_lea.vmem %s33_s26, 9216  ;;  %p3501_p4 = scmp.lt.s32.totalorder %s33_s26, %s33_s26 }
   0xa   :  { %p3497_p3 = scmp.ne.s32.totalorder %s33_s26, %s3496_s17  ;;  %p3502_p5 = scmp.lt.s32.totalorder %s3496_s17, %s3496_s17 }
   0xc   :  { %p3503_p6 = por %p3502_p5, %p3501_p4 }
   0xe   :  { %p3504_p7 = pnand %p3503_p6, %p3497_p3 }
  0x10   :  { %3507 = shalt.err (!%p3504_p7)
}
  0x11   :  { %s3559_s18 = smov 256   ;;  %s3560_s19 = smov 16  }
  0x12   :  { %38 = dma.hbm_to_vmem [thread:$0]  %s4073_s3, 9216, %s33_s26, [#allocation5], %s3559_s18, %s3559_s18, %s3560_s19  }
  0x13   :  { %s3561_s22 = smov [#allocation7]   ;;  %s3508_s27 = scalar_lea.hbm %s4075_s5, 32768 }
  0x14   :  { %s46_s23 = sshll.u32 %s3561_s22, 4  ;;  %p3509_p8 = scmp.ne.s32.totalorder %s4075_s5, %s3508_s27  ;;  %s47_s23 = int_to_ptr.vmem [resolvable:$true] %s46_s23 }
  0x15   :  { %p3512_p9 = scmp.lt.u32.totalorder %s3508_s27, %s4075_s5 }
  0x17   :  { %p3514_p10 = pnand %p3512_p9, %p3509_p8 }
  0x19   :  { %3517 = shalt.err (!%p3514_p10)
}
  0x1a   :  { %s3518_s15 = scalar_lea.vmem %s47_s23, 32768  ;;  %p3523_p12 = scmp.lt.s32.totalorder %s47_s23, %s47_s23 }
  0x1b   :  { %p3519_p11 = scmp.ne.s32.totalorder %s47_s23, %s3518_s15  ;;  %p3524_p13 = scmp.lt.s32.totalorder %s3518_s15, %s3518_s15 }
  0x1d   :  { %p3525_p0 = por %p3524_p13, %p3523_p12 }
  0x1f   :  { %p3526_p1 = pnand %p3525_p0, %p3519_p11 }
  0x21   :  { %3529 = shalt.err (!%p3526_p1)
}
  0x22   :  { %52 = dma.hbm_to_vmem [thread:$0]  %s4075_s5, 32768, %s47_s23, [#allocation8], %s3559_s18, %s3559_s18, %s3560_s19  }
  0x23   :  { %3552 = dma.done.wait [#allocation5], 9216  }
  0x24   :  { %3553 = vsyncadd [#allocation5], 4294958080 }
  0x25   :  { %3554 = dma.done.wait [#allocation8], 32768  }
  0x26   :  { %3555 = vsyncadd [#allocation8], 4294934528  ;;  %vm83_vm0 = vcmask 64512   ;;  %v73_v0 = vld [vmem:[%s4070_s0] sm:$0xff]  ;;  %s3562_s22 = smov 124   ;;  %s3563_s24 = smov 126  }
  0x27   :  { %v328_v1 = vld [vmem:[%s4070_s0 + $0x1] sm:$0xff]  ;;  %243 = vrot.lane.b32.xlu0 %v73_v0, %s3562_s22  ;;  %v329_v3 = vld [vmem:[%s4070_s0 + $0x9] sm:$0x3]  ;;  %2921 = vmatprep.mubr.msk.f32.mxu0 %vm83_vm0, %v73_v0  ;;  %v242_v5 = vld [vmem:[%s4071_s1 + $0x10] sm:$0xff]  ;;  %vm857_vm1 = vcmask 388096   ;;  %v3564_v27 = vmov 0.0  }
  0x28   :  { %415 = vrot.lane.b32.xlu1 %v328_v1, %s3563_s24  ;;  %v74_v2 = vld [vmem:[%s4070_s0 + $0x8] sm:$0x3]  ;;  %v75_v4 = vld [vmem:[%s4071_s1] sm:$0xff]  ;;  %v330_v6 = vld [vmem:[%s4071_s1 + $0x18] sm:$0xff]  ;;  %858 = vst.msk [vmem:[#allocation2 + $0x8] sm:$0xf] %vm857_vm1, %v3564_v27 }
  0x29   :  { %2919 = vmatprep.subr.mxu0 %v75_v4  ;;  %v586_v7 = vld [vmem:[%s4070_s0 + $0x2] sm:$0xff]  ;;  %v587_v8 = vld [vmem:[%s4070_s0 + $0xa] sm:$0x3]  ;;  %v588_v19 = vld [vmem:[%s4071_s1 + $0x30] sm:$0xff]  ;;  %vm855_vm2 = vcmask 392192   ;;  %s3565_s29 = smov 8  }
  0x2a   :  { %2920 = vmatpush3.msra.mxu0 %v75_v4  ;;  %v76_v9 = vld [vmem:[%s4071_s1 + $0x8] sm:$0xff]  ;;  %v414_v12 = vld [vmem:[%s4071_s1 + $0x20] sm:$0xff]  ;;  %v672_v22 = vld [vmem:[%s4071_s1 + $0x38] sm:$0xff]  ;;  %856 = vst.msk [vmem:[#allocation2] sm:$0xff] %vm855_vm2, %v3564_v27  ;;  %vm871_vm3 = vcmask 320576   ;;  %vm863_vm4 = vcmask 322624  }
  0x2b   :  { %245 = vrot.lane.b32.xlu0 %v74_v2, %s3562_s22  ;;  %2924 = vmatprep.subr.mxu0 %v242_v5  ;;  %v500_v15 = vld [vmem:[%s4071_s1 + $0x28] sm:$0xff]  ;;  %v758_v23 = vld [vmem:[%s4071_s1 + $0x40] sm:$0xff]  ;;  %v886_v40 = vld [vmem:[#allocation4 + $0x58] sm:$0xff]  ;;  %vm869_vm5 = vcmask 326726   ;;  %s3567_s30 = smov 112   ;;  %vm897_vm6 = vcmask 261120  }
  0x2c   :  { %417 = vrot.lane.b32.xlu1 %v329_v3, %s3563_s24  ;;  %2922 = vmatmul.mubr.msk.f32.vlgmr.msra.gmra.mrb[0].mxu0 %vm83_vm0, %v74_v2  ;;  %v2803_v31 = vld [vmem:[%s4072_s2] ss:$0 sm:$0xff]  ;;  %v884_v39 = vld [vmem:[#allocation4 + $0x48] sm:$0xff]  ;;  %v885_v43 = vld [vmem:[#allocation4 + $0x50] sm:$0xff]  ;;  %s3566_s2 = smov 120   ;;  %vm3571_vm8 = vmmov 0  }
  0x2d   :  { %2925 = vmatpush3.msra.mxu0 %v242_v5  ;;  %2914 = vmatprep.subr.mxu1 %v76_v9  ;;  %v883_v41 = vld [vmem:[#allocation4 + $0x40] sm:$0xff]  ;;  %v3013_v42 = vpack.c.bf16 %v886_v40, %v884_v39  ;;  %v888_v44 = vld [vmem:[#allocation4 + $0x68] sm:$0xff]  ;;  %v890_v45 = vld [vmem:[#allocation4 + $0x78] sm:$0xff]  ;;  %vm2682_vm9 = vcmask 523264   ;;  %vm2756_vm10 = vcmask 25600  }
  0x2e   :  { %2929 = vmatprep.subr.mxu0 %v330_v6  ;;  %2915 = vmatpush3.msra.mxu1 %v76_v9  ;;  %v3015_v46 = vpack.c.bf16 %v885_v43, %v883_v41  ;;  %v3017_v47 = vpack.c.bf16 %v890_v45, %v888_v44  ;;  %v887_v48 = vld [vmem:[#allocation4 + $0x60] sm:$0xff]  ;;  %v889_v49 = vld [vmem:[#allocation4 + $0x70] sm:$0xff]  ;;  %v876_v50 = vld [vmem:[#allocation4 + $0x8] sm:$0xff] }
  0x2f   :  { %501 = vrot.lane.b32.xlu0 %v328_v1, %s3562_s22  ;;  %3014 = vmatprep.subr.bf16.mxu1 %v3013_v42  ;;  %v878_v51 = vld [vmem:[#allocation4 + $0x18] sm:$0xff]  ;;  %v3019_v52 = vpack.c.bf16 %v889_v49, %v887_v48  ;;  %v1930_v62 = vld [vmem:[#allocation7 + $0x208] sm:$0xff]  ;;  %v1955_v39 = vld [vmem:[#allocation7 + $0x2d0] sm:$0xff] }
  0x30   :  { %503 = vrot.lane.b32.xlu1 %v329_v3, %s3562_s22  ;;  %v3021_v53 = vpack.c.bf16 %v878_v51, %v876_v50  ;;  %v1932_v63 = vld [vmem:[#allocation7 + $0x218] sm:$0xff]  ;;  %v1934_v4 = vld [vmem:[#allocation7 + $0x228] sm:$0xff]  ;;  %v1957_v44 = vld [vmem:[#allocation7 + $0x2e0] sm:$0xff] }
  0x31   :  { %v1936_v5 = vld [vmem:[#allocation7 + $0x238] sm:$0xff]  ;;  %v1958_v41 = vld [vmem:[#allocation7 + $0x2e8] sm:$0xff]  ;;  %v1959_v45 = vld [vmem:[#allocation7 + $0x2f0] sm:$0xff] }
  0x32   :  { %v1960_v42 = vld [vmem:[#allocation7 + $0x2f8] sm:$0xff]  ;;  %v1961_v50 = vld [vmem:[#allocation7 + $0x300] sm:$0xff]  ;;  %v1963_v51 = vld [vmem:[#allocation7 + $0x310] sm:$0xff] }
  0x33   :  { %673 = vrot.lane.b32.xlu0 %v586_v7, %s3563_s24  ;;  %v3177_v43 = vpack.c.bf16 %v1960_v42, %v1958_v41  ;;  %v1964_v48 = vld [vmem:[#allocation7 + $0x318] sm:$0xff]  ;;  %v1260_v41 = vld [vmem:[#allocation4 + $0x130] sm:$0xff]  ;;  %v1352_v42 = vld [vmem:[#allocation4 + $0x148] sm:$0xff] }
  0x34   :  { %675 = vrot.lane.b32.xlu1 %v587_v8, %s3563_s24 }
  0x37   :  { %79 = vrot.lane.b32.xlu0 %v73_v0, %s3563_s24  ;;  %v3149_v0 = vpack.c.bf16 %v1932_v63, %v1930_v62  ;;  %v882_v62 = vld [vmem:[#allocation4 + $0x38] sm:$0xff] }
  0x38   :  { %759 = vrot.lane.b32.xlu1 %v586_v7, %s3562_s22 }
  0x3b   :  { %81 = vrot.lane.b32.xlu0 %v74_v2, %s3563_s24  ;;  %v1931_v2 = vld [vmem:[#allocation7 + $0x210] sm:$0xff] }
  0x3c   :  { %761 = vrot.lane.b32.xlu1 %v587_v8, %s3562_s22 }
  0x99   :  { %v244_v10 = vpop.permute.xlu0 %243 }
  0x9a   :  { %2926 = vmatprep.mubr.msk.f32.mxu0 %vm83_vm0, %v244_v10  ;;  %v416_v14 = vpop.permute.xlu1 %415  ;;  %v1938_v10 = vld [vmem:[#allocation7 + $0x248] sm:$0xff] }
  0x9d   :  { %v246_v11 = vpop.permute.xlu0 %245 }
  0x9e   :  { %2927 = vmatmul.mubr.msk.f32.vlgmr.msra.gmra.mrb[0].mxu0 %vm83_vm0, %v246_v11  ;;  %v418_v18 = vpop.permute.xlu1 %417  ;;  %v1940_v11 = vld [vmem:[#allocation7 + $0x258] sm:$0xff] }
  0x9f   :  { %2930 = vmatpush3.msra.mxu0 %v330_v6  ;;  %2931 = vmatprep.mubr.msk.f32.mxu0 %vm83_vm0, %v328_v1  ;;  %v1929_v1 = vld [vmem:[#allocation7 + $0x200] sm:$0xff] }
  0xa0   :  { %2934 = vmatprep.subr.mxu0 %v414_v12  ;;  %v1933_v6 = vld [vmem:[#allocation7 + $0x220] sm:$0xff] }
  0xa1   :  { %v502_v13 = vpop.permute.xlu0 %501 }
  0xa2   :  { %v504_v21 = vpop.permute.xlu1 %503 }
  0xa5   :  { %v674_v16 = vpop.permute.xlu0 %673 }
  0xa6   :  { %2932 = vmatmul.mubr.msk.f32.vlgmr.msra.gmra.mrb[0].mxu0 %vm83_vm0, %v329_v3  ;;  %v676_v24 = vpop.permute.xlu1 %675  ;;  %v3151_v3 = vpack.c.bf16 %v1931_v2, %v1929_v1  ;;  %v879_v1 = vld [vmem:[#allocation4 + $0x20] sm:$0xff]  ;;  %v881_v2 = vld [vmem:[#allocation4 + $0x30] sm:$0xff] }
  0xa7   :  { %2935 = vmatpush3.msra.mxu0 %v414_v12  ;;  %2936 = vmatprep.mubr.msk.f32.mxu0 %vm83_vm0, %v416_v14  ;;  %v1937_v12 = vld [vmem:[#allocation7 + $0x240] sm:$0xff]  ;;  %v3157_v14 = vpack.c.bf16 %v1940_v11, %v1938_v10  ;;  %v1065_v11 = vld [vmem:[#allocation4 + $0xa8] sm:$0xff] }
  0xa8   :  { %2939 = vmatprep.subr.mxu0 %v500_v15 }
  0xa9   :  { %v80_v17 = vpop.permute.xlu0 %79 }
  0xaa   :  { %2916 = vmatprep.mubr.msk.f32.mxu1 %vm83_vm0, %v80_v17  ;;  %v760_v25 = vpop.permute.xlu1 %759  ;;  %v1944_v17 = vld [vmem:[#allocation7 + $0x278] sm:$0xff] }
  0xad   :  { %v82_v20 = vpop.permute.xlu0 %81 }
  0xae   :  { %2937 = vmatmul.mubr.msk.f32.vlgmr.msra.gmra.mrb[0].mxu0 %vm83_vm0, %v418_v18  ;;  %2917 = vmatmul.mubr.msk.f32.vlgmr.msra.gmra.mrb[0].mxu1 %vm83_vm0, %v82_v20  ;;  %v762_v26 = vpop.permute.xlu1 %761  ;;  %v1943_v20 = vld [vmem:[#allocation7 + $0x270] sm:$0xff] }
  0xaf   :  { %2940 = vmatpush3.msra.mxu0 %v500_v15  ;;  %2941 = vmatprep.mubr.msk.f32.mxu0 %vm83_vm0, %v502_v13  ;;  %v1939_v13 = vld [vmem:[#allocation7 + $0x250] sm:$0xff] }
  0xb0   :  { %2944 = vmatprep.subr.mxu0 %v588_v19  ;;  %966 = vmatprep.mubr.f32.mxu1 %v3564_v27  ;;  %v3159_v15 = vpack.c.bf16 %v1939_v13, %v1937_v12  ;;  %v1067_v12 = vld [vmem:[#allocation4 + $0xb8] sm:$0xff] }
  0xb1   :  { %3016 = vmatpush1.bf16.msra.mxu1 %v3015_v46  ;;  %v3179_v46 = vpack.c.bf16 %v1959_v45, %v1957_v44 }
  0xb2   :  { %3018 = vmatprep.subr.bf16.mxu1 %v3017_v47  ;;  %v1962_v47 = vld [vmem:[#allocation7 + $0x308] sm:$0xff] }
  0xb3   :  { %v3181_v49 = vpack.c.bf16 %v1964_v48, %v1962_v47  ;;  %v1353_v47 = vld [vmem:[#allocation4 + $0x150] sm:$0xff]  ;;  %v1356_v48 = vld [vmem:[#allocation4 + $0x168] sm:$0xff] }
  0xb5   :  { %3020 = vmatpush1.bf16.msra.mxu1 %v3019_v52  ;;  %v3183_v52 = vpack.c.bf16 %v1963_v51, %v1961_v50 }
  0xb6   :  { %2942 = vmatmul.mubr.msk.f32.vlgmr.msra.gmra.mrb[0].mxu0 %vm83_vm0, %v504_v21  ;;  %3022 = vmatprep.subr.bf16.mxu1 %v3021_v53  ;;  %v875_v53 = vld [vmem:[#allocation4] sm:$0xff] }
  0xb7   :  { %2945 = vmatpush3.msra.mxu0 %v588_v19  ;;  %2946 = vmatprep.mubr.msk.f32.mxu0 %vm83_vm0, %v586_v7  ;;  %v3153_v7 = vpack.c.bf16 %v1936_v5, %v1934_v4  ;;  %v1941_v19 = vld [vmem:[#allocation7 + $0x260] sm:$0xff]  ;;  %v1061_v4 = vld [vmem:[#allocation4 + $0x88] sm:$0xff]  ;;  %v1063_v5 = vld [vmem:[#allocation4 + $0x98] sm:$0xff] }
  0xb8   :  { %2949 = vmatprep.subr.mxu0 %v672_v22  ;;  %v3163_v21 = vpack.c.bf16 %v1943_v20, %v1941_v19 }
  0xbe   :  { %2947 = vmatmul.mubr.msk.f32.vlgmr.msra.gmra.mrb[0].mxu0 %vm83_vm0, %v587_v8  ;;  %v1935_v8 = vld [vmem:[#allocation7 + $0x230] sm:$0xff] }
  0xbf   :  { %2950 = vmatpush3.msra.mxu0 %v672_v22  ;;  %2951 = vmatprep.mubr.msk.f32.mxu0 %vm83_vm0, %v674_v16  ;;  %v3155_v9 = vpack.c.bf16 %v1935_v8, %v1933_v6  ;;  %v1942_v16 = vld [vmem:[#allocation7 + $0x268] sm:$0xff]  ;;  %v3027_v6 = vpack.c.bf16 %v881_v2, %v879_v1  ;;  %v1060_v8 = vld [vmem:[#allocation4 + $0x80] sm:$0xff] }
  0xc0   :  { %2954 = vmatprep.subr.mxu0 %v758_v23  ;;  %v3161_v18 = vpack.c.bf16 %v1944_v17, %v1942_v16  ;;  %v1946_v22 = vld [vmem:[#allocation7 + $0x288] sm:$0xff]  ;;  %v1066_v16 = vld [vmem:[#allocation4 + $0xb0] sm:$0xff] }
  0xc1   :  { %v1160_v17 = vld [vmem:[#allocation4 + $0xc8] sm:$0xff] }
  0xc2   :  { %v1455_v2 = vld [vmem:[#allocation4 + $0x1a8] sm:$0xff] }
  0xc6   :  { %2952 = vmatmul.mubr.msk.f32.vlgmr.msra.gmra.mrb[0].mxu0 %vm83_vm0, %v676_v24 }
  0xc7   :  { %2955 = vmatpush3.msra.mxu0 %v758_v23  ;;  %2956 = vmatprep.mubr.msk.f32.mxu0 %vm83_vm0, %v760_v25  ;;  %v1948_v23 = vld [vmem:[#allocation7 + $0x298] sm:$0xff]  ;;  %v1945_v25 = vld [vmem:[#allocation7 + $0x280] sm:$0xff] }
  0xc8   :  { %3150 = vmatprep.subr.bf16.mxu0 %v3149_v0  ;;  %v3165_v24 = vpack.c.bf16 %v1948_v23, %v1946_v22  ;;  %v1161_v22 = vld [vmem:[#allocation4 + $0xd0] sm:$0xff]  ;;  %v1164_v23 = vld [vmem:[#allocation4 + $0xe8] sm:$0xff] }
  0xce   :  { %2957 = vmatmul.mubr.msk.f32.vlgmr.msra.gmra.mrb[0].mxu0 %vm83_vm0, %v762_v26  ;;  %v1947_v26 = vld [vmem:[#allocation7 + $0x290] sm:$0xff] }
  0xcf   :  { %3152 = vmatpush1.bf16.msra.mxu0 %v3151_v3 }
  0xd0   :  { %3154 = vmatprep.subr.bf16.mxu0 %v3153_v7  ;;  %v3029_v7 = vpack.c.bf16 %v1063_v5, %v1061_v4 }
  0xd3   :  { %3156 = vmatpush1.bf16.msra.mxu0 %v3155_v9  ;;  %v1062_v9 = vld [vmem:[#allocation4 + $0x90] sm:$0xff] }
  0xd4   :  { %3158 = vmatprep.subr.bf16.mxu0 %v3157_v14  ;;  %v3031_v13 = vpack.c.bf16 %v1062_v9, %v1060_v8  ;;  %v3033_v14 = vpack.c.bf16 %v1067_v12, %v1065_v11  ;;  %v1546_v9 = vld [vmem:[#allocation4 + $0x1c8] sm:$0xff] }
  0xd7   :  { %3160 = vmatpush1.bf16.msra.mxu0 %v3159_v15  ;;  %v1064_v15 = vld [vmem:[#allocation4 + $0xa0] sm:$0xff] }
  0xd8   :  { %3162 = vmatprep.subr.bf16.mxu0 %v3161_v18  ;;  %v1162_v18 = vld [vmem:[#allocation4 + $0xd8] sm:$0xff]  ;;  %v3035_v19 = vpack.c.bf16 %v1066_v16, %v1064_v15  ;;  %v1550_v16 = vld [vmem:[#allocation4 + $0x1e8] sm:$0xff] }
  0xd9   :  { %v3037_v20 = vpack.c.bf16 %v1162_v18, %v1160_v17  ;;  %v1552_v17 = vld [vmem:[#allocation4 + $0x1f8] sm:$0xff] }
  0xdb   :  { %3164 = vmatpush1.bf16.msra.mxu0 %v3163_v21  ;;  %v1159_v21 = vld [vmem:[#allocation4 + $0xc0] sm:$0xff] }
  0xdc   :  { %3166 = vmatprep.subr.bf16.mxu0 %v3165_v24  ;;  %v1166_v24 = vld [vmem:[#allocation4 + $0xf8] sm:$0xff] }
 0x181   :  { %v2918_v28 = vpop.f32.mrb[0].mxu1 }
 0x182   :  { %v154_v29 = vpop.f32.mrb[1].mxu1 }
 0x1a1   :  { %v2958_v30 = vpop.f32.mrb[0].mxu0 }
 0x1a2   :  { %v3409_v32 = vadd.f32 %v2958_v30, %v2918_v28  ;;  %v833_v33 = vpop.f32.mrb[1].mxu0  ;;  %v3167_v28 = vpack.c.bf16 %v1947_v26, %v1945_v25  ;;  %v1952_v30 = vld [vmem:[#allocation7 + $0x2b8] sm:$0xff]  ;;  %v3039_v25 = vpack.c.bf16 %v1161_v22, %v1159_v21  ;;  %v3041_v26 = vpack.c.bf16 %v1166_v24, %v1164_v23  ;;  %v1551_v21 = vld [vmem:[#allocation4 + $0x1f0] sm:$0xff]  ;;  %v1643_v22 = vld [vmem:[#allocation4 + $0x208] sm:$0xff] }
 0x1a3   :  { %v3410_v34 = vadd.f32 %v833_v33, %v154_v29  ;;  %v1950_v29 = vld [vmem:[#allocation7 + $0x2a8] sm:$0xff]  ;;  %v1951_v33 = vld [vmem:[#allocation7 + $0x2b0] sm:$0xff]  ;;  %v1645_v23 = vld [vmem:[#allocation4 + $0x218] sm:$0xff] }
 0x1a4   :  { %v852_v35 = vadd.f32 %v3409_v32, %v2803_v31  ;;  %v1949_v32 = vld [vmem:[#allocation7 + $0x2a0] sm:$0xff]  ;;  %3168 = vmatpush1.bf16.msra.mxu0 %v3167_v28  ;;  %v1165_v28 = vld [vmem:[#allocation4 + $0xf0] sm:$0xff] }
 0x1a5   :  { %v851_v36 = vadd.f32 %v3410_v34, %v2803_v31  ;;  %v3169_v31 = vpack.c.bf16 %v1952_v30, %v1950_v29  ;;  %v3171_v34 = vpack.c.bf16 %v1951_v33, %v1949_v32  ;;  %v1255_v30 = vld [vmem:[#allocation4 + $0x108] sm:$0xff] }
 0x1a6   :  { %v854_v37 = vmax.f32 %v852_v35, 0.0  ;;  %v1954_v35 = vld [vmem:[#allocation7 + $0x2c8] sm:$0xff] }
 0x1a7   :  { %v853_v38 = vmax.f32 %v851_v36, 0.0  ;;  %v1956_v36 = vld [vmem:[#allocation7 + $0x2d8] sm:$0xff]  ;;  %3170 = vmatprep.subr.bf16.mxu0 %v3169_v31 }
 0x1a8   :  { %866 = vrot.lane.b32.xlu1 %v854_v37, %s3565_s29  ;;  %v3173_v37 = vpack.c.bf16 %v1956_v36, %v1954_v35  ;;  %3172 = vmatpush1.bf16.msra.mxu0 %v3171_v34  ;;  %v1257_v31 = vld [vmem:[#allocation4 + $0x118] sm:$0xff]  ;;  %v1256_v34 = vld [vmem:[#allocation4 + $0x110] sm:$0xff]  ;;  %v1259_v36 = vld [vmem:[#allocation4 + $0x128] sm:$0xff] }
 0x1a9   :  { %860 = vrot.lane.b32.xlu0 %v853_v38, %s3565_s29  ;;  %v1953_v38 = vld [vmem:[#allocation7 + $0x2c0] sm:$0xff]  ;;  %v3045_v33 = vpack.c.bf16 %v1257_v31, %v1255_v30 }
 0x1aa   :  { %v3175_v40 = vpack.c.bf16 %v1955_v39, %v1953_v38  ;;  %3174 = vmatprep.subr.bf16.mxu0 %v3173_v37  ;;  %v1261_v37 = vld [vmem:[#allocation4 + $0x138] sm:$0xff] }
 0x1ab   :  { %v3049_v39 = vpack.c.bf16 %v1261_v37, %v1259_v36  ;;  %v1867_v37 = vld [vmem:[#allocation7 + $0x10] sm:$0xff] }
 0x1ac   :  { %3176 = vmatpush1.bf16.msra.mxu0 %v3175_v40  ;;  %v1258_v40 = vld [vmem:[#allocation4 + $0x120] sm:$0xff] }
 0x1ad   :  { %3178 = vmatprep.subr.bf16.mxu0 %v3177_v43  ;;  %v1354_v43 = vld [vmem:[#allocation4 + $0x158] sm:$0xff]  ;;  %v3051_v44 = vpack.c.bf16 %v1260_v41, %v1258_v40 }
 0x1ae   :  { %v3053_v45 = vpack.c.bf16 %v1354_v43, %v1352_v42  ;;  %v1872_v40 = vld [vmem:[#allocation7 + $0x38] sm:$0xff]  ;;  %v1869_v43 = vld [vmem:[#allocation7 + $0x20] sm:$0xff] }
 0x1b0   :  { %3180 = vmatpush1.bf16.msra.mxu0 %v3179_v46  ;;  %v1351_v46 = vld [vmem:[#allocation4 + $0x140] sm:$0xff] }
 0x1b1   :  { %3182 = vmatprep.subr.bf16.mxu0 %v3181_v49  ;;  %v1358_v49 = vld [vmem:[#allocation4 + $0x178] sm:$0xff]  ;;  %v3055_v50 = vpack.c.bf16 %v1353_v47, %v1351_v46  ;;  %v1874_v46 = vld [vmem:[#allocation7 + $0x48] sm:$0xff] }
 0x1b2   :  { %v3057_v51 = vpack.c.bf16 %v1358_v49, %v1356_v48  ;;  %v1876_v47 = vld [vmem:[#allocation7 + $0x58] sm:$0xff] }
 0x1b3   :  { %v3093_v49 = vpack.c.bf16 %v1876_v47, %v1874_v46  ;;  %v1972_v46 = vld [vmem:[#allocation7 + $0x358] sm:$0xff]  ;;  %v1969_v47 = vld [vmem:[#allocation7 + $0x340] sm:$0xff] }
 0x1b4   :  { %3184 = vmatpush1.bf16.msra.mxu0 %v3183_v52  ;;  %v1357_v52 = vld [vmem:[#allocation4 + $0x170] sm:$0xff] }
 0x21a   :  { %v867_v54 = vpop.permute.xlu1 %866 }
 0x21b   :  { %872 = vst.msk [vmem:[#allocation2 + $0x9] sm:$0x3] %vm871_vm3, %v867_v54  ;;  %v861_v55 = vpop.permute.xlu0 %860  ;;  %v877_v54 = vld [vmem:[#allocation4 + $0x10] sm:$0xff] }
 0x21c   :  { %864 = vst.msk [vmem:[#allocation2 + $0x1] sm:$0xf] %vm863_vm4, %v861_v55  ;;  %v3023_v63 = vpack.c.bf16 %v877_v54, %v875_v53  ;;  %v1451_v54 = vld [vmem:[#allocation4 + $0x188] sm:$0xff] }
 0x21d   :  { %870 = vst.msk [vmem:[#allocation2 + $0x1] sm:$0xc0] %vm869_vm5, %v861_v55  ;;  %v880_v55 = vld [vmem:[#allocation4 + $0x28] sm:$0xff] }
 0x21e   :  { %v3025_v0 = vpack.c.bf16 %v882_v62, %v880_v55  ;;  %v1453_v55 = vld [vmem:[#allocation4 + $0x198] sm:$0xff] }
 0x222   :  { %v3744_v58 = vld [vmem:[#allocation2 + $0x9] sm:$0x3] }
 0x223   :  { %v3752_v60 = vld [vmem:[#allocation2 + $0xa] sm:$0x3] }
 0x224   :  { %v3736_v56 = vld [vmem:[#allocation2 + $0x8] sm:$0x3]  ;;  %v3738_v57 = vld [vmem:[#allocation2] sm:$0xff] }
 0x225   :  { %895 = vrot.lane.b32.xlu1 %v3736_v56, %s3566_s2  ;;  %893 = vrot.lane.b32.xlu0 %v3738_v57, %s3566_s2  ;;  %v3746_v59 = vld [vmem:[#allocation2 + $0x1] sm:$0xff] }
 0x226   :  { %v3754_v61 = vld [vmem:[#allocation2 + $0x2] sm:$0xff] }
 0x229   :  { %1070 = vrot.lane.b32.xlu1 %v3736_v56, %s3567_s30  ;;  %1068 = vrot.lane.b32.xlu0 %v3738_v57, %s3567_s30 }
 0x22d   :  { %1264 = vrot.lane.b32.xlu1 %v3744_v58, %s3566_s2  ;;  %1262 = vrot.lane.b32.xlu0 %v3746_v59, %s3566_s2 }
 0x231   :  { %1361 = vrot.lane.b32.xlu1 %v3744_v58, %s3567_s30  ;;  %1359 = vrot.lane.b32.xlu0 %v3746_v59, %s3567_s30 }
 0x235   :  { %1555 = vrot.lane.b32.xlu1 %v3752_v60, %s3566_s2  ;;  %1553 = vrot.lane.b32.xlu0 %v3754_v61, %s3566_s2 }
 0x239   :  { %1652 = vrot.lane.b32.xlu1 %v3752_v60, %s3567_s30  ;;  %1650 = vrot.lane.b32.xlu0 %v3754_v61, %s3567_s30 }
 0x297   :  { %v894_v3 = vpop.permute.xlu0 %893  ;;  %v896_v10 = vpop.permute.xlu1 %895 }
 0x298   :  { %2804 = vmatmul.mubr.msk.f32.vlgmr.msra.gmra.mrb[2].mxu1 %vm897_vm6, %v894_v3  ;;  %v1457_v3 = vld [vmem:[#allocation4 + $0x1b8] sm:$0xff] }
 0x299   :  { %3024 = vmatpush1.bf16.msra.mxu1 %v3023_v63  ;;  %972 = vmatprep.mubr.f32.mxu1 %v3564_v27  ;;  %v3061_v63 = vpack.c.bf16 %v1453_v55, %v1451_v54  ;;  %v3065_v5 = vpack.c.bf16 %v1457_v3, %v1455_v2  ;;  %v1881_v3 = vld [vmem:[#allocation7 + $0x80] sm:$0xff] }
 0x29a   :  { %3026 = vmatprep.subr.bf16.mxu1 %v3025_v0  ;;  %v1452_v0 = vld [vmem:[#allocation4 + $0x190] sm:$0xff] }
 0x29b   :  { %v1069_v29 = vpop.permute.xlu0 %1068  ;;  %v1071_v35 = vpop.permute.xlu1 %1070 }
 0x29c   :  { %2805 = vmatmul.mubr.msk.f32.gmra.mrb[4].mxu1 %vm897_vm6, %v896_v10  ;;  %v1548_v10 = vld [vmem:[#allocation4 + $0x1d8] sm:$0xff] }
 0x29d   :  { %3028 = vmatpush1.bf16.msra.mxu1 %v3027_v6  ;;  %1047 = vmatprep.mubr.f32.mxu1 %v3564_v27  ;;  %v1454_v6 = vld [vmem:[#allocation4 + $0x1a0] sm:$0xff]  ;;  %v3069_v12 = vpack.c.bf16 %v1548_v10, %v1546_v9  ;;  %v1887_v10 = vld [vmem:[#allocation7 + $0xb0] sm:$0xff] }
 0x29e   :  { %3030 = vmatprep.subr.bf16.mxu1 %v3029_v7  ;;  %v1456_v7 = vld [vmem:[#allocation4 + $0x1b0] sm:$0xff]  ;;  %v1885_v9 = vld [vmem:[#allocation7 + $0xa0] sm:$0xff] }
 0x29f   :  { %v1263_v53 = vpop.permute.xlu0 %1262  ;;  %v1265_v1 = vpop.permute.xlu1 %1264  ;;  %v3067_v11 = vpack.c.bf16 %v1456_v7, %v1454_v6  ;;  %v1888_v6 = vld [vmem:[#allocation7 + $0xb8] sm:$0xff] }
 0x2a0   :  { %2806 = vmatmul.mubr.msk.f32.vlgmr.msra.gmra.mrb[2].mxu1 %vm897_vm6, %v3738_v57  ;;  %v1163_v57 = vld [vmem:[#allocation4 + $0xe0] sm:$0xff] }
 0x2a1   :  { %3032 = vmatpush1.bf16.msra.mxu1 %v3031_v13  ;;  %1053 = vmatprep.mubr.f32.mxu1 %v3564_v27  ;;  %v3043_v32 = vpack.c.bf16 %v1165_v28, %v1163_v57  ;;  %v1545_v13 = vld [vmem:[#allocation4 + $0x1c0] sm:$0xff]  ;;  %v1644_v57 = vld [vmem:[#allocation4 + $0x210] sm:$0xff]  ;;  %v1647_v28 = vld [vmem:[#allocation4 + $0x228] sm:$0xff] }
 0x2a2   :  { %3034 = vmatprep.subr.bf16.mxu1 %v3033_v14  ;;  %v1547_v14 = vld [vmem:[#allocation4 + $0x1d0] sm:$0xff] }
 0x2a3   :  { %v1360_v8 = vpop.permute.xlu0 %1359  ;;  %v1362_v15 = vpop.permute.xlu1 %1361  ;;  %v3071_v18 = vpack.c.bf16 %v1547_v14, %v1545_v13  ;;  %v3107_v13 = vpack.c.bf16 %v1887_v10, %v1885_v9  ;;  %v1980_v10 = vld [vmem:[#allocation7 + $0x398] sm:$0xff] }
 0x2a4   :  { %2807 = vmatmul.mubr.msk.f32.gmra.mrb[4].mxu1 %vm897_vm6, %v3736_v56  ;;  %v1254_v56 = vld [vmem:[#allocation4 + $0x100] sm:$0xff] }
 0x2a5   :  { %3036 = vmatpush1.bf16.msra.mxu1 %v3035_v19  ;;  %1140 = vmatprep.mubr.f32.mxu1 %v3564_v27  ;;  %v3047_v38 = vpack.c.bf16 %v1256_v34, %v1254_v56  ;;  %v3073_v19 = vpack.c.bf16 %v1552_v17, %v1550_v16  ;;  %v1866_v56 = vld [vmem:[#allocation7 + $0x8] sm:$0xff]  ;;  %v1868_v34 = vld [vmem:[#allocation7 + $0x18] sm:$0xff]  ;;  %v1891_v16 = vld [vmem:[#allocation7 + $0xd0] sm:$0xff] }
 0x2a6   :  { %3038 = vmatprep.subr.bf16.mxu1 %v3037_v20  ;;  %v1549_v20 = vld [vmem:[#allocation4 + $0x1e0] sm:$0xff]  ;;  %v3085_v36 = vpack.c.bf16 %v1868_v34, %v1866_v56  ;;  %v1894_v17 = vld [vmem:[#allocation7 + $0xe8] sm:$0xff] }
 0x2a7   :  { %v3075_v24 = vpack.c.bf16 %v1551_v21, %v1549_v20  ;;  %v1893_v21 = vld [vmem:[#allocation7 + $0xe0] sm:$0xff]  ;;  %v1966_v56 = vld [vmem:[#allocation7 + $0x328] sm:$0xff] }
 0x2a8   :  { %2808 = vmatmul.mubr.msk.f32.vlgmr.msra.gmra.mrb[2].mxu1 %vm897_vm6, %v1069_v29  ;;  %v1649_v29 = vld [vmem:[#allocation4 + $0x238] sm:$0xff] }
 0x2a9   :  { %3040 = vmatpush1.bf16.msra.mxu1 %v3039_v25  ;;  %1146 = vmatprep.mubr.f32.mxu1 %v3564_v27  ;;  %v3077_v25 = vpack.c.bf16 %v1645_v23, %v1643_v22  ;;  %v3081_v31 = vpack.c.bf16 %v1649_v29, %v1647_v28  ;;  %v1895_v22 = vld [vmem:[#allocation7 + $0xf0] sm:$0xff]  ;;  %v1898_v23 = vld [vmem:[#allocation7 + $0x108] sm:$0xff] }
 0x2aa   :  { %3042 = vmatprep.subr.bf16.mxu1 %v3041_v26  ;;  %v1642_v26 = vld [vmem:[#allocation4 + $0x200] sm:$0xff]  ;;  %v1899_v28 = vld [vmem:[#allocation7 + $0x110] sm:$0xff] }
 0x2ab   :  { %v3079_v30 = vpack.c.bf16 %v1644_v57, %v1642_v26  ;;  %v1897_v57 = vld [vmem:[#allocation7 + $0x100] sm:$0xff] }
 0x2ac   :  { %2809 = vmatmul.mubr.msk.f32.gmra.mrb[4].mxu1 %vm897_vm6, %v1071_v35  ;;  %v3119_v29 = vpack.c.bf16 %v1899_v28, %v1897_v57  ;;  %v1922_v57 = vld [vmem:[#allocation7 + $0x1c8] sm:$0xff]  ;;  %v1924_v28 = vld [vmem:[#allocation7 + $0x1d8] sm:$0xff] }
 0x2ad   :  { %3044 = vmatpush1.bf16.msra.mxu1 %v3043_v32  ;;  %1237 = vmatprep.mubr.f32.mxu1 %v3564_v27  ;;  %v1648_v32 = vld [vmem:[#allocation4 + $0x230] sm:$0xff] }
 0x2ae   :  { %3046 = vmatprep.subr.bf16.mxu1 %v3045_v33  ;;  %v1554_v33 = vpop.permute.xlu0 %1553 }
 0x2b0   :  { %2810 = vmatmul.mubr.msk.f32.vlgmr.msra.gmra.mrb[2].mxu1 %vm897_vm6, %v3746_v59  ;;  %v1355_v59 = vld [vmem:[#allocation4 + $0x160] sm:$0xff] }
 0x2b1   :  { %3048 = vmatpush1.bf16.msra.mxu1 %v3047_v38  ;;  %1243 = vmatprep.mubr.f32.mxu1 %v3564_v27  ;;  %v3059_v62 = vpack.c.bf16 %v1357_v52, %v1355_v59  ;;  %v1556_v38 = vpop.permute.xlu1 %1555  ;;  %v1878_v52 = vld [vmem:[#allocation7 + $0x68] sm:$0xff] }
 0x2b2   :  { %3050 = vmatprep.subr.bf16.mxu1 %v3049_v39  ;;  %v1870_v39 = vld [vmem:[#allocation7 + $0x28] sm:$0xff] }
 0x2b3   :  { %v3089_v42 = vpack.c.bf16 %v1872_v40, %v1870_v39  ;;  %v1906_v39 = vld [vmem:[#allocation7 + $0x148] sm:$0xff]  ;;  %v1908_v40 = vld [vmem:[#allocation7 + $0x158] sm:$0xff] }
 0x2b4   :  { %2811 = vmatmul.mubr.msk.f32.gmra.mrb[4].mxu1 %vm897_vm6, %v3744_v58  ;;  %v1450_v58 = vld [vmem:[#allocation4 + $0x180] sm:$0xff] }
 0x2b5   :  { %3052 = vmatpush1.bf16.msra.mxu1 %v3051_v44  ;;  %1334 = vmatprep.mubr.f32.mxu1 %v3564_v27  ;;  %v3063_v4 = vpack.c.bf16 %v1452_v0, %v1450_v58  ;;  %v1871_v44 = vld [vmem:[#allocation7 + $0x30] sm:$0xff]  ;;  %v1653_v59 = vpop.permute.xlu1 %1652  ;;  %v1882_v58 = vld [vmem:[#allocation7 + $0x88] sm:$0xff]  ;;  %v1884_v0 = vld [vmem:[#allocation7 + $0x98] sm:$0xff] }
 0x2b6   :  { %3054 = vmatprep.subr.bf16.mxu1 %v3053_v45  ;;  %v1651_v45 = vpop.permute.xlu0 %1650  ;;  %v3091_v48 = vpack.c.bf16 %v1871_v44, %v1869_v43  ;;  %v3101_v2 = vpack.c.bf16 %v1884_v0, %v1882_v58  ;;  %v1907_v43 = vld [vmem:[#allocation7 + $0x150] sm:$0xff]  ;;  %v1970_v44 = vld [vmem:[#allocation7 + $0x348] sm:$0xff]  ;;  %v1973_v58 = vld [vmem:[#allocation7 + $0x360] sm:$0xff] }
 0x2b7   :  { %v1975_v0 = vld [vmem:[#allocation7 + $0x370] sm:$0xff] }
 0x2b8   :  { %2812 = vmatmul.mubr.msk.f32.vlgmr.msra.gmra.mrb[2].mxu1 %vm897_vm6, %v1263_v53  ;;  %v1880_v53 = vld [vmem:[#allocation7 + $0x78] sm:$0xff] }
 0x2b9   :  { %3056 = vmatpush1.bf16.msra.mxu1 %v3055_v50  ;;  %1340 = vmatprep.mubr.f32.mxu1 %v3564_v27  ;;  %v1873_v50 = vld [vmem:[#allocation7 + $0x40] sm:$0xff]  ;;  %v3097_v55 = vpack.c.bf16 %v1880_v53, %v1878_v52 }
 0x2ba   :  { %3058 = vmatprep.subr.bf16.mxu1 %v3057_v51  ;;  %v1875_v51 = vld [vmem:[#allocation7 + $0x50] sm:$0xff]  ;;  %v1909_v53 = vld [vmem:[#allocation7 + $0x160] sm:$0xff] }
 0x2bb   :  { %v3095_v54 = vpack.c.bf16 %v1875_v51, %v1873_v50  ;;  %v1910_v51 = vld [vmem:[#allocation7 + $0x168] sm:$0xff] }
 0x2bc   :  { %2813 = vmatmul.mubr.msk.f32.gmra.mrb[4].mxu1 %vm897_vm6, %v1265_v1 }
 0x2bd   :  { %3060 = vmatpush1.bf16.msra.mxu1 %v3059_v62  ;;  %1431 = vmatprep.mubr.f32.mxu1 %v3564_v27  ;;  %v1877_v62 = vld [vmem:[#allocation7 + $0x60] sm:$0xff] }
 0x2be   :  { %3062 = vmatprep.subr.bf16.mxu1 %v3061_v63  ;;  %v1879_v63 = vld [vmem:[#allocation7 + $0x70] sm:$0xff] }
 0x2bf   :  { %v3099_v1 = vpack.c.bf16 %v1879_v63, %v1877_v62  ;;  %v1976_v63 = vld [vmem:[#allocation7 + $0x378] sm:$0xff] }
 0x2c0   :  { %2814 = vmatmul.mubr.msk.f32.vlgmr.msra.gmra.mrb[2].mxu1 %vm897_vm6, %v1360_v8 }
 0x2c1   :  { %3064 = vmatpush1.bf16.msra.mxu1 %v3063_v4  ;;  %1437 = vmatprep.mubr.f32.mxu1 %v3564_v27  ;;  %v1883_v4 = vld [vmem:[#allocation7 + $0x90] sm:$0xff] }
 0x2c2   :  { %3066 = vmatprep.subr.bf16.mxu1 %v3065_v5  ;;  %v1886_v5 = vld [vmem:[#allocation7 + $0xa8] sm:$0xff]  ;;  %v3103_v7 = vpack.c.bf16 %v1883_v4, %v1881_v3  ;;  %v1916_v4 = vld [vmem:[#allocation7 + $0x198] sm:$0xff] }
 0x2c3   :  { %v3105_v8 = vpack.c.bf16 %v1888_v6, %v1886_v5  ;;  %v1914_v3 = vld [vmem:[#allocation7 + $0x188] sm:$0xff]  ;;  %v1913_v6 = vld [vmem:[#allocation7 + $0x180] sm:$0xff] }
 0x2c4   :  { %2815 = vmatmul.mubr.msk.f32.gmra.mrb[4].mxu1 %vm897_vm6, %v1362_v15  ;;  %v1889_v15 = vld [vmem:[#allocation7 + $0xc0] sm:$0xff]  ;;  %v3133_v5 = vpack.c.bf16 %v1916_v4, %v1914_v3 }
 0x2c5   :  { %3068 = vmatpush1.bf16.msra.mxu1 %v3067_v11  ;;  %1528 = vmatprep.mubr.f32.mxu1 %v3564_v27  ;;  %v1890_v11 = vld [vmem:[#allocation7 + $0xc8] sm:$0xff] }
 0x2c6   :  { %3070 = vmatprep.subr.bf16.mxu1 %v3069_v12  ;;  %v1892_v12 = vld [vmem:[#allocation7 + $0xd8] sm:$0xff] }
 0x2c7   :  { %v3109_v14 = vpack.c.bf16 %v1892_v12, %v1890_v11  ;;  %v1977_v11 = vld [vmem:[#allocation7 + $0x380] sm:$0xff]  ;;  %v1979_v12 = vld [vmem:[#allocation7 + $0x390] sm:$0xff] }
 0x2c8   :  { %2816 = vmatmul.mubr.msk.f32.vlgmr.msra.gmra.mrb[2].mxu1 %vm897_vm6, %v3754_v61  ;;  %v1646_v61 = vld [vmem:[#allocation4 + $0x220] sm:$0xff] }
 0x2c9   :  { %3072 = vmatpush1.bf16.msra.mxu1 %v3071_v18  ;;  %1534 = vmatprep.mubr.f32.mxu1 %v3564_v27  ;;  %v3083_v35 = vpack.c.bf16 %v1648_v32, %v1646_v61  ;;  %v1896_v18 = vld [vmem:[#allocation7 + $0xf8] sm:$0xff]  ;;  %v1901_v32 = vld [vmem:[#allocation7 + $0x120] sm:$0xff] }
 0x2ca   :  { %3074 = vmatprep.subr.bf16.mxu1 %v3073_v19  ;;  %v3111_v19 = vpack.c.bf16 %v1891_v16, %v1889_v15  ;;  %v3113_v20 = vpack.c.bf16 %v1896_v18, %v1894_v17  ;;  %v1918_v15 = vld [vmem:[#allocation7 + $0x1a8] sm:$0xff]  ;;  %v1920_v16 = vld [vmem:[#allocation7 + $0x1b8] sm:$0xff]  ;;  %v1917_v18 = vld [vmem:[#allocation7 + $0x1a0] sm:$0xff] }
 0x2cb   :  { %v3137_v17 = vpack.c.bf16 %v1920_v16, %v1918_v15 }
 0x2cc   :  { %2817 = vmatmul.mubr.msk.f32.gmra.mrb[4].mxu1 %vm897_vm6, %v3752_v60  ;;  %v1865_v60 = vld [vmem:[#allocation7] sm:$0xff] }
 0x2cd   :  { %3076 = vmatpush1.bf16.msra.mxu1 %v3075_v24  ;;  %1625 = vmatprep.mubr.f32.mxu1 %v3564_v27  ;;  %v3087_v41 = vpack.c.bf16 %v1867_v37, %v1865_v60  ;;  %v1900_v24 = vld [vmem:[#allocation7 + $0x118] sm:$0xff]  ;;  %v1967_v60 = vld [vmem:[#allocation7 + $0x330] sm:$0xff] }
 0x2ce   :  { %3078 = vmatprep.subr.bf16.mxu1 %v3077_v25  ;;  %v3115_v25 = vpack.c.bf16 %v1895_v22, %v1893_v21  ;;  %v3117_v26 = vpack.c.bf16 %v1900_v24, %v1898_v23  ;;  %v1984_v22 = vld [vmem:[#allocation7 + $0x3b8] sm:$0xff]  ;;  %v1981_v23 = vld [vmem:[#allocation7 + $0x3a0] sm:$0xff]  ;;  %v1983_v24 = vld [vmem:[#allocation7 + $0x3b0] sm:$0xff] }
 0x2d0   :  { %2818 = vmatmul.mubr.msk.f32.vlgmr.msra.gmra.mrb[2].mxu1 %vm897_vm6, %v1554_v33  ;;  %v1903_v33 = vld [vmem:[#allocation7 + $0x130] sm:$0xff] }
 0x2d1   :  { %3080 = vmatpush1.bf16.msra.mxu1 %v3079_v30  ;;  %1631 = vmatprep.mubr.f32.mxu1 %v3564_v27  ;;  %v1902_v30 = vld [vmem:[#allocation7 + $0x128] sm:$0xff]  ;;  %v3123_v34 = vpack.c.bf16 %v1903_v33, %v1901_v32  ;;  %v1988_v32 = vld [vmem:[#allocation7 + $0x3d8] sm:$0xff] }
 0x2d2   :  { %3082 = vmatprep.subr.bf16.mxu1 %v3081_v31  ;;  %v1904_v31 = vld [vmem:[#allocation7 + $0x138] sm:$0xff] }
 0x2d3   :  { %v3121_v61 = vpack.c.bf16 %v1904_v31, %v1902_v30  ;;  %v3141_v30 = vpack.c.bf16 %v1924_v28, %v1922_v57  ;;  %v1923_v31 = vld [vmem:[#allocation7 + $0x1d0] sm:$0xff] }
 0x2d4   :  { %2819 = vmatmul.mubr.msk.f32.gmra.mrb[4].mxu1 %vm897_vm6, %v1556_v38 }
 0x2d5   :  { %3084 = vmatpush1.bf16.msra.mxu1 %v3083_v35  ;;  %1722 = vmatprep.mubr.f32.mxu1 %v3564_v27  ;;  %v1968_v35 = vld [vmem:[#allocation7 + $0x338] sm:$0xff] }
 0x2d6   :  { %3086 = vmatprep.subr.bf16.mxu1 %v3085_v36  ;;  %v1965_v36 = vld [vmem:[#allocation7 + $0x320] sm:$0xff]  ;;  %v3185_v37 = vpack.c.bf16 %v1968_v35, %v1966_v56  ;;  %v1987_v35 = vld [vmem:[#allocation7 + $0x3d0] sm:$0xff] }
 0x2d7   :  { %v3187_v38 = vpack.c.bf16 %v1967_v60, %v1965_v36  ;;  %v1926_v36 = vld [vmem:[#allocation7 + $0x1e8] sm:$0xff] }
 0x2d8   :  { %2820 = vmatmul.mubr.msk.f32.vlgmr.msra.gmra.mrb[2].mxu1 %vm897_vm6, %v1651_v45  ;;  %3186 = vmatprep.subr.bf16.mxu0 %v3185_v37  ;;  %v1928_v37 = vld [vmem:[#allocation7 + $0x1f8] sm:$0xff] }
 0x2d9   :  { %1728 = vmatprep.mubr.f32.mxu1 %v3564_v27  ;;  %3088 = vmatpush1.bf16.msra.mxu1 %v3087_v41  ;;  %v3125_v41 = vpack.c.bf16 %v1908_v40, %v1906_v39  ;;  %v1927_v39 = vld [vmem:[#allocation7 + $0x1f0] sm:$0xff]  ;;  %v3145_v40 = vpack.c.bf16 %v1928_v37, %v1926_v36 }
 0x2da   :  { %3090 = vmatprep.subr.bf16.mxu1 %v3089_v42  ;;  %v1905_v42 = vld [vmem:[#allocation7 + $0x140] sm:$0xff]  ;;  %3188 = vmatpush1.bf16.msra.mxu0 %v3187_v38 }
 0x2db   :  { %v3127_v45 = vpack.c.bf16 %v1907_v43, %v1905_v42  ;;  %v1925_v38 = vld [vmem:[#allocation7 + $0x1e0] sm:$0xff]  ;;  %v1990_v42 = vld [vmem:[#allocation7 + $0x3e8] sm:$0xff]  ;;  %v1992_v43 = vld [vmem:[#allocation7 + $0x3f8] sm:$0xff] }
 0x2dc   :  { %2821 = vmatmul.mubr.msk.f32.gmra.mrb[4].mxu1 %vm897_vm6, %v1653_v59  ;;  %v1912_v59 = vld [vmem:[#allocation7 + $0x178] sm:$0xff] }
 0x2dd   :  { %3092 = vmatpush1.bf16.msra.mxu1 %v3091_v48  ;;  %v1971_v48 = vld [vmem:[#allocation7 + $0x350] sm:$0xff]  ;;  %v3129_v52 = vpack.c.bf16 %v1912_v59, %v1910_v51  ;;  %v1741_v51 = vlaneseq }
 0x2de   :  { %3094 = vmatprep.subr.bf16.mxu1 %v3093_v49  ;;  %v3189_v49 = vpack.c.bf16 %v1972_v46, %v1970_v44  ;;  %v3191_v50 = vpack.c.bf16 %v1971_v48, %v1969_v47  ;;  %v1989_v44 = vld [vmem:[#allocation7 + $0x3e0] sm:$0xff]  ;;  %v1991_v46 = vld [vmem:[#allocation7 + $0x3f0] sm:$0xff]  ;;  %v1994_v48 = vld [vmem:[#allocation7 + $0x408] sm:$0xff] }
 0x2df   :  { %v3211_v47 = vpack.c.bf16 %v1991_v46, %v1989_v44  ;;  %v3801_v59 = vshrl.u32 %v1741_v51, 7  ;;  %vm3813_vm7 = vcmp.lt.s32.totalorder %v1741_v51, 256  ;;  %v2000_v44 = vld [vmem:[#allocation7 + $0x438] sm:$0xff] }
 0x2e0   :  { %3190 = vmatprep.subr.bf16.mxu0 %v3189_v49  ;;  %v1996_v49 = vld [vmem:[#allocation7 + $0x418] sm:$0xff] }
 0x2e1   :  { %3096 = vmatpush1.bf16.msra.mxu1 %v3095_v54  ;;  %v1911_v54 = vld [vmem:[#allocation7 + $0x170] sm:$0xff]  ;;  %3192 = vmatpush1.bf16.msra.mxu0 %v3191_v50  ;;  %v3213_v50 = vpack.c.bf16 %v1996_v49, %v1994_v48  ;;  %v1997_v49 = vld [vmem:[#allocation7 + $0x420] sm:$0xff] }
 0x2e2   :  { %3098 = vmatprep.subr.bf16.mxu1 %v3097_v55  ;;  %v1974_v55 = vld [vmem:[#allocation7 + $0x368] sm:$0xff]  ;;  %v3131_v62 = vpack.c.bf16 %v1911_v54, %v1909_v53  ;;  %v1739_v53 = vld [vmem:[%s4074_s4] sm:$0x3]  ;;  %v1747_v54 = vsub.s32 1, %v3801_v59 }
 0x2e5   :  { %3100 = vmatpush1.bf16.msra.mxu1 %v3099_v1  ;;  %v3193_v1 = vpack.c.bf16 %v1976_v63, %v1974_v55  ;;  %v3568_v55 = vmov 1966171168  }
 0x2e6   :  { %3102 = vmatprep.subr.bf16.mxu1 %v3101_v2  ;;  %v3195_v2 = vpack.c.bf16 %v1975_v0, %v1973_v58  ;;  %v1748_v58 = vrot.slane %v1739_v53, %v1747_v54 }
 0x2e7   :  { %3194 = vmatprep.subr.bf16.mxu0 %v3193_v1 }
 0x2e8   :  { %3196 = vmatpush1.bf16.msra.mxu0 %v3195_v2 }
 0x2e9   :  { %3104 = vmatpush1.bf16.msra.mxu1 %v3103_v7  ;;  %v1915_v7 = vld [vmem:[#allocation7 + $0x190] sm:$0xff] }
 0x2ea   :  { %3106 = vmatprep.subr.bf16.mxu1 %v3105_v8  ;;  %v1978_v8 = vld [vmem:[#allocation7 + $0x388] sm:$0xff]  ;;  %v3135_v9 = vpack.c.bf16 %v1915_v7, %v1913_v6 }
 0x2ed   :  { %3108 = vmatpush1.bf16.msra.mxu1 %v3107_v13  ;;  %v3197_v13 = vpack.c.bf16 %v1980_v10, %v1978_v8 }
 0x2ee   :  { %3110 = vmatprep.subr.bf16.mxu1 %v3109_v14  ;;  %v3199_v14 = vpack.c.bf16 %v1979_v12, %v1977_v11 }
 0x2ef   :  { %3198 = vmatprep.subr.bf16.mxu0 %v3197_v13 }
 0x2f0   :  { %3200 = vmatpush1.bf16.msra.mxu0 %v3199_v14 }
 0x2f1   :  { %3112 = vmatpush1.bf16.msra.mxu1 %v3111_v19  ;;  %v1919_v19 = vld [vmem:[#allocation7 + $0x1b0] sm:$0xff] }
 0x2f2   :  { %3114 = vmatprep.subr.bf16.mxu1 %v3113_v20  ;;  %v1982_v20 = vld [vmem:[#allocation7 + $0x3a8] sm:$0xff]  ;;  %v3139_v21 = vpack.c.bf16 %v1919_v19, %v1917_v18  ;;  %v2015_v18 = vld [vmem:[#allocation7 + $0x4b0] sm:$0xff] }
 0x2f5   :  { %3116 = vmatpush1.bf16.msra.mxu1 %v3115_v25  ;;  %v3201_v25 = vpack.c.bf16 %v1984_v22, %v1982_v20 }
 0x2f6   :  { %3118 = vmatprep.subr.bf16.mxu1 %v3117_v26  ;;  %v3203_v26 = vpack.c.bf16 %v1983_v24, %v1981_v23  ;;  %v3569_v24 = vmov 1983009808  }
 0x2f7   :  { %3202 = vmatprep.subr.bf16.mxu0 %v3201_v25  ;;  %v2137_v25 = vunpack.c.l.s4 %v3569_v24  ;;  %v2019_v24 = vld [vmem:[#allocation7 + $0x4d0] sm:$0xff] }
 0x2f8   :  { %3204 = vmatpush1.bf16.msra.mxu0 %v3203_v26 }
 0x2f9   :  { %3120 = vmatpush1.bf16.msra.mxu1 %v3119_v29  ;;  %v1921_v29 = vld [vmem:[#allocation7 + $0x1c0] sm:$0xff] }
 0x2fa   :  { %3122 = vmatprep.subr.bf16.mxu1 %v3121_v61  ;;  %v1986_v61 = vld [vmem:[#allocation7 + $0x3c8] sm:$0xff]  ;;  %v3143_v33 = vpack.c.bf16 %v1923_v31, %v1921_v29 }
 0x2fb   :  { %v3205_v56 = vpack.c.bf16 %v1988_v32, %v1986_v61 }
 0x2fd   :  { %3124 = vmatpush1.bf16.msra.mxu1 %v3123_v34  ;;  %v1985_v34 = vld [vmem:[#allocation7 + $0x3c0] sm:$0xff]  ;;  %3206 = vmatprep.subr.bf16.mxu0 %v3205_v56  ;;  %v2138_v56 = vunpack.c.0.s8 %v2137_v25  ;;  %v2022_v25 = vld [vmem:[#allocation7 + $0x4e8] sm:$0xff] }
 0x2fe   :  { %3126 = vmatprep.subr.bf16.mxu1 %v3125_v41  ;;  %v3207_v60 = vpack.c.bf16 %v1987_v35, %v1985_v34  ;;  %v3147_v41 = vpack.c.bf16 %v1927_v39, %v1925_v38  ;;  %v1993_v38 = vld [vmem:[#allocation7 + $0x400] sm:$0xff]  ;;  %v1995_v39 = vld [vmem:[#allocation7 + $0x410] sm:$0xff] }
 0x2ff   :  { %v3834_v35 = vsub.s32 %v2138_v56, %v3801_v59  ;;  %v2025_v56 = vld [vmem:[#allocation7 + $0x500] sm:$0xff] }
 0x300   :  { %3208 = vmatpush1.bf16.msra.mxu0 %v3207_v60 }
 0x301   :  { %3128 = vmatpush1.bf16.msra.mxu1 %v3127_v45  ;;  %v3209_v45 = vpack.c.bf16 %v1992_v43, %v1990_v42  ;;  %v1998_v43 = vld [vmem:[#allocation7 + $0x428] sm:$0xff] }
 0x302   :  { %3130 = vmatprep.subr.bf16.mxu1 %v3129_v52  ;;  %v1743_v52 = vsub.s32 0, %v3801_v59  ;;  %v3217_v48 = vpack.c.bf16 %v2000_v44, %v1998_v43  ;;  %v2036_v43 = vld [vmem:[#allocation7 + $0x558] sm:$0xff] }
 0x303   :  { %3210 = vmatprep.subr.bf16.mxu0 %v3209_v45 }
 0x304   :  { %3212 = vmatpush1.bf16.msra.mxu0 %v3211_v47  ;;  %v1744_v63 = vrot.slane %v1739_v53, %v1743_v52  ;;  %v3215_v47 = vpack.c.bf16 %v1995_v39, %v1993_v38  ;;  %v2002_v53 = vld [vmem:[#allocation7 + $0x448] sm:$0xff]  ;;  %v2029_v39 = vld [vmem:[#allocation7 + $0x520] sm:$0xff] }
 0x305   :  { %3132 = vmatpush1.bf16.msra.mxu1 %v3131_v62  ;;  %3214 = vmatprep.subr.bf16.mxu0 %v3213_v50  ;;  %v1763_v62 = vunpack.c.l.s4 %v3568_v55  ;;  %v1999_v50 = vld [vmem:[#allocation7 + $0x430] sm:$0xff]  ;;  %v2004_v55 = vld [vmem:[#allocation7 + $0x458] sm:$0xff] }
 0x306   :  { %3134 = vmatprep.subr.bf16.mxu1 %v3133_v5 }
 0x307   :  { %v1764_v1 = vunpack.c.0.s8 %v1763_v62  ;;  %v3219_v62 = vpack.c.bf16 %v1999_v50, %v1997_v49  ;;  %v2038_v49 = vld [vmem:[#allocation7 + $0x568] sm:$0xff]  ;;  %v2040_v50 = vld [vmem:[#allocation7 + $0x578] sm:$0xff] }
 0x309   :  { %3136 = vmatpush1.bf16.msra.mxu1 %v3135_v9  ;;  %v1767_v6 = vsub.s32 %v1764_v1, %v3801_v59  ;;  %v2006_v1 = vld [vmem:[#allocation7 + $0x468] sm:$0xff]  ;;  %v2575_v59 = vld [vmem:[%s4079_s9 + $0x10] sm:$0xff] }
 0x30a   :  { %3138 = vmatprep.subr.bf16.mxu1 %v3137_v17 }
 0x30d   :  { %3140 = vmatpush1.bf16.msra.mxu1 %v3139_v21 }
 0x30e   :  { %3142 = vmatprep.subr.bf16.mxu1 %v3141_v30 }
 0x311   :  { %3144 = vmatpush1.bf16.msra.mxu1 %v3143_v33 }
 0x312   :  { %3146 = vmatprep.subr.bf16.mxu1 %v3145_v40 }
 0x315   :  { %3148 = vmatpush1.bf16.msra.mxu1 %v3147_v41 }
 0x3ab   :  { %v1724_v0 = vpop.f32.mrb[2].mxu1 }
 0x3ac   :  { %v1751_v2 = vadd.f32 %v1744_v63, %v1724_v0  ;;  %v1726_v3 = vpop.f32.mrb[3].mxu1  ;;  %v2003_v0 = vld [vmem:[#allocation7 + $0x450] sm:$0xff] }
 0x3ad   :  { %v1752_v4 = vadd.f32 %v1748_v58, %v1726_v3 }
 0x3ae   :  { %v1755_v5 = vmax.f32 %v1751_v2, 0.0  ;;  %v2008_v2 = vld [vmem:[#allocation7 + $0x478] sm:$0xff] }
 0x3af   :  { %v1756_v7 = vmax.f32 %v1752_v4, 0.0  ;;  %v1730_v8 = vpop.f32.mrb[4].mxu1  ;;  %v3225_v4 = vpack.c.bf16 %v2008_v2, %v2006_v1  ;;  %v2041_v2 = vld [vmem:[#allocation7 + $0x580] sm:$0xff] }
 0x3b0   :  { %v1753_v9 = vadd.f32 %v1744_v63, %v1730_v8  ;;  %v1732_v10 = vpop.f32.mrb[5].mxu1  ;;  %v3221_v63 = vpack.c.bf16 %v2004_v55, %v2002_v53  ;;  %v2012_v8 = vld [vmem:[#allocation7 + $0x498] sm:$0xff]  ;;  %v3257_v53 = vpack.c.bf16 %v2040_v50, %v2038_v49  ;;  %v2037_v55 = vld [vmem:[#allocation7 + $0x560] sm:$0xff] }
 0x3b1   :  { %v1761_v11 = vcombine.low %v1755_v5, %v1756_v7  ;;  %v1801_v12 = vcombine.high %v1755_v5, %v1756_v7  ;;  %v1754_v13 = vadd.f32 %v1748_v58, %v1732_v10  ;;  %v2001_v58 = vld [vmem:[#allocation7 + $0x440] sm:$0xff]  ;;  %v2010_v7 = vld [vmem:[#allocation7 + $0x488] sm:$0xff] }
 0x3b2   :  { %v1757_v14 = vmax.f32 %v1753_v9, 0.0  ;;  %v3223_v3 = vpack.c.bf16 %v2003_v0, %v2001_v58  ;;  %v2005_v5 = vld [vmem:[#allocation7 + $0x460] sm:$0xff]  ;;  %v3229_v10 = vpack.c.bf16 %v2012_v8, %v2010_v7  ;;  %v2044_v58 = vld [vmem:[#allocation7 + $0x598] sm:$0xff] }
 0x3b3   :  { %v1768_v15 = vrot.slane %v1761_v11, %v1767_v6  ;;  %v1808_v16 = vrot.slane %v1801_v12, %v1767_v6  ;;  %v1758_v17 = vmax.f32 %v1754_v13, 0.0  ;;  %v2009_v11 = vld [vmem:[#allocation7 + $0x480] sm:$0xff]  ;;  %v2011_v12 = vld [vmem:[#allocation7 + $0x490] sm:$0xff]  ;;  %v2014_v13 = vld [vmem:[#allocation7 + $0x4a8] sm:$0xff] }
 0x3b4   :  { %v2045_v8 = vld [vmem:[#allocation7 + $0x5a0] sm:$0xff] }
 0x3b5   :  { %v1775_v19 = vrot.slane %v1768_v15, %v1767_v6  ;;  %v1782_v20 = vcombine.high %v1768_v15, %v1768_v15  ;;  %v1815_v21 = vrot.slane %v1808_v16, %v1767_v6  ;;  %v1820_v22 = vcombine.high %v1808_v16, %v1808_v16  ;;  %v2073_v50 = vld [vmem:[#allocation7 + $0x680] sm:$0xff] }
 0x3b6   :  { %v1834_v23 = vcombine.low %v1757_v14, %v1758_v17  ;;  %v2016_v14 = vld [vmem:[#allocation7 + $0x4b8] sm:$0xff]  ;;  %v3231_v15 = vpack.c.bf16 %v2011_v12, %v2009_v11  ;;  %v2013_v17 = vld [vmem:[#allocation7 + $0x4a0] sm:$0xff] }
 0x3b7   :  { %1781 = vst.msk [vmem:[#allocation3] ss:$2 sm:$0x3] %vm3813_vm7, %v1775_v19  ;;  %v1789_v26 = vrot.slane %v1782_v20, %v1767_v6  ;;  %v1793_v57 = vcombine.high %v1775_v19, %v1775_v19  ;;  %v1816_v28 = vcombine.high %v1815_v21, %v1815_v21  ;;  %v1827_v29 = vrot.slane %v1820_v22, %v1767_v6  ;;  %v2018_v19 = vld [vmem:[#allocation7 + $0x4c8] sm:$0xff]  ;;  %v2020_v20 = vld [vmem:[#allocation7 + $0x4d8] sm:$0xff] }
 0x3b8   :  { %v1841_v30 = vrot.slane %v1834_v23, %v1767_v6  ;;  %v3233_v16 = vpack.c.bf16 %v2016_v14, %v2014_v13  ;;  %v3235_v21 = vpack.c.bf16 %v2015_v18, %v2013_v17  ;;  %v3237_v22 = vpack.c.bf16 %v2020_v20, %v2018_v19  ;;  %v2017_v23 = vld [vmem:[#allocation7 + $0x4c0] sm:$0xff]  ;;  %v2052_v11 = vld [vmem:[#allocation7 + $0x5d8] sm:$0xff] }
 0x3b9   :  { %1792 = vst.msk [vmem:[#allocation3 + $0x4] ss:$2 sm:$0x3] %vm3813_vm7, %v1789_v26  ;;  %1796 = vst.msk [vmem:[#allocation3 + $0x8] ss:$2 sm:$0x3] %vm3813_vm7, %v1793_v57  ;;  %v1797_v31 = vcombine.high %v1789_v26, %v1789_v26  ;;  %v1828_v61 = vcombine.high %v1827_v29, %v1827_v29  ;;  %v3239_v57 = vpack.c.bf16 %v2019_v24, %v2017_v23 }
 0x3ba   :  { %1819 = vst.msk [vmem:[#allocation3 + $0x1] ss:$2 sm:$0x3] %vm3813_vm7, %v1816_v28  ;;  %v1848_v32 = vrot.slane %v1841_v30, %v1767_v6  ;;  %v1852_v33 = vcombine.high %v1841_v30, %v1841_v30  ;;  %v2024_v26 = vld [vmem:[#allocation7 + $0x4f8] sm:$0xff]  ;;  %v2021_v29 = vld [vmem:[#allocation7 + $0x4e0] sm:$0xff]  ;;  %v2023_v30 = vld [vmem:[#allocation7 + $0x4f0] sm:$0xff] }
 0x3bb   :  { %1800 = vst.msk [vmem:[#allocation3 + $0xc] ss:$2 sm:$0x3] %vm3813_vm7, %v1797_v31  ;;  %1831 = vst.msk [vmem:[#allocation3 + $0x5] ss:$2 sm:$0x3] %vm3813_vm7, %v1828_v61  ;;  %v3241_v28 = vpack.c.bf16 %v2024_v26, %v2022_v25 }
 0x3bc   :  { %1851 = vst.msk [vmem:[#allocation3 + $0x9] ss:$2 sm:$0x3] %vm3813_vm7, %v1848_v32  ;;  %v1859_v34 = vrot.slane %v1852_v33, %v1767_v6  ;;  %v2007_v6 = vld [vmem:[#allocation7 + $0x470] sm:$0xff]  ;;  %v2026_v31 = vld [vmem:[#allocation7 + $0x508] sm:$0xff]  ;;  %v2028_v61 = vld [vmem:[#allocation7 + $0x518] sm:$0xff]  ;;  %v3243_v32 = vpack.c.bf16 %v2023_v30, %v2021_v29 }
 0x3bd   :  { %v3227_v9 = vpack.c.bf16 %v2007_v6, %v2005_v5  ;;  %v3245_v33 = vpack.c.bf16 %v2028_v61, %v2026_v31  ;;  %v2048_v5 = vld [vmem:[#allocation7 + $0x5b8] sm:$0xff]  ;;  %v2049_v14 = vld [vmem:[#allocation7 + $0x5c0] sm:$0xff]  ;;  %v2062_v30 = vld [vmem:[#allocation7 + $0x628] sm:$0xff] }
 0x3be   :  { %1862 = vst.msk [vmem:[#allocation3 + $0xd] ss:$2 sm:$0x3] %vm3813_vm7, %v1859_v34  ;;  %v2027_v34 = vld [vmem:[#allocation7 + $0x510] sm:$0xff]  ;;  %v2056_v17 = vld [vmem:[#allocation7 + $0x5f8] sm:$0xff]  ;;  %v2053_v20 = vld [vmem:[#allocation7 + $0x5e0] sm:$0xff] }
 0x3bf   :  { %v2060_v23 = vld [vmem:[#allocation7 + $0x618] sm:$0xff] }
 0x3c0   :  { %v2064_v31 = vld [vmem:[#allocation7 + $0x638] sm:$0xff] }
 0x3c2   :  { %v1863_v36 = vld [vmem:[#allocation3] sm:$0xff] }
 0x3c3   :  { %v2142_v60 = vrot.slane %v1863_v36, %v3834_v35  ;;  %v2135_v37 = vcombine.high %v1863_v36, %v1863_v36  ;;  %v2030_v36 = vld [vmem:[#allocation7 + $0x528] sm:$0xff] }
 0x3c5   :  { %v2150_v40 = vcombine.high %v2142_v60, %v2142_v60  ;;  %v2149_v41 = vrot.slane %v2135_v37, %v3834_v35  ;;  %v3838_v42 = vld [vmem:[#allocation3 + $0x8] sm:$0xff]  ;;  %v3247_v37 = vpack.c.bf16 %v2027_v34, %v2025_v56  ;;  %v2063_v56 = vld [vmem:[#allocation7 + $0x630] sm:$0xff]  ;;  %v2066_v34 = vld [vmem:[#allocation7 + $0x648] sm:$0xff] }
 0x3c6   :  { %v3842_v45 = vrot.slane %v3838_v42, %v3834_v35  ;;  %v2152_v24 = vcombine.high %v3838_v42, %v3838_v42 }
 0x3c7   :  { %2241 = vmatprep.mubr.f32.mxu1 %v2150_v40  ;;  %v2151_v46 = vcombine.high %v2149_v41, %v2149_v41  ;;  %v2031_v40 = vld [vmem:[#allocation7 + $0x530] sm:$0xff] }
 0x3c8   :  { %2242 = vmatmul.mubr.f32.vlgmr.msra.gmra.mrb[6].mxu1 %v2142_v60  ;;  %v2167_v51 = vcombine.high %v3842_v45, %v3842_v45  ;;  %v2032_v60 = vld [vmem:[#allocation7 + $0x538] sm:$0xff]  ;;  %v3251_v44 = vpack.c.bf16 %v2031_v40, %v2029_v39  ;;  %v3849_v29 = vrot.slane %v2152_v24, %v3834_v35  ;;  %v2070_v39 = vld [vmem:[#allocation7 + $0x668] sm:$0xff]  ;;  %v2087_v24 = vld [vmem:[#allocation7 + $0x6f0] sm:$0xff] }
 0x3c9   :  { %2312 = vmatprep.mubr.f32.mxu0 %v2151_v46  ;;  %v3249_v38 = vpack.c.bf16 %v2032_v60, %v2030_v36  ;;  %v2068_v36 = vld [vmem:[#allocation7 + $0x658] sm:$0xff] }
 0x3ca   :  { %2313 = vmatmul.mubr.f32.vlgmr.msra.gmra.mrb[2].mxu0 %v2149_v41  ;;  %v2034_v41 = vld [vmem:[#allocation7 + $0x548] sm:$0xff]  ;;  %v2168_v42 = vcombine.high %v3849_v29, %v3849_v29  ;;  %v3285_v35 = vpack.c.bf16 %v2068_v36, %v2066_v34  ;;  %v2072_v40 = vld [vmem:[#allocation7 + $0x678] sm:$0xff]  ;;  %v2089_v34 = vld [vmem:[#allocation7 + $0x700] sm:$0xff] }
 0x3cb   :  { %3216 = vmatpush1.bf16.msra.mxu0 %v3215_v47  ;;  %2383 = vmatprep.mubr.f32.mxu0 %v2167_v51  ;;  %v3253_v46 = vpack.c.bf16 %v2036_v43, %v2034_v41  ;;  %v2033_v47 = vld [vmem:[#allocation7 + $0x540] sm:$0xff]  ;;  %v3289_v43 = vpack.c.bf16 %v2072_v40, %v2070_v39  ;;  %v2091_v36 = vld [vmem:[#allocation7 + $0x710] sm:$0xff]  ;;  %v2470_v40 = vld [vmem:[%s4077_s7 + $0x38] sm:$0xff] }
 0x3cc   :  { %3218 = vmatprep.subr.bf16.mxu0 %v3217_v48  ;;  %v2035_v48 = vld [vmem:[#allocation7 + $0x550] sm:$0xff] }
 0x3cd   :  { %v3255_v51 = vpack.c.bf16 %v2035_v48, %v2033_v47  ;;  %v2074_v47 = vld [vmem:[#allocation7 + $0x688] sm:$0xff]  ;;  %v2076_v48 = vld [vmem:[#allocation7 + $0x698] sm:$0xff]  ;;  %v2469_v39 = vld [vmem:[%s4077_s7 + $0x30] sm:$0xff] }
 0x3cf   :  { %3220 = vmatpush1.bf16.msra.mxu0 %v3219_v62  ;;  %v2039_v62 = vld [vmem:[#allocation7 + $0x570] sm:$0xff] }
 0x3d0   :  { %3222 = vmatprep.subr.bf16.mxu0 %v3221_v63  ;;  %v2042_v63 = vld [vmem:[#allocation7 + $0x588] sm:$0xff]  ;;  %v3259_v0 = vpack.c.bf16 %v2039_v62, %v2037_v55  ;;  %v2080_v55 = vld [vmem:[#allocation7 + $0x6b8] sm:$0xff] }
 0x3d1   :  { %v3261_v1 = vpack.c.bf16 %v2044_v58, %v2042_v63  ;;  %v2077_v58 = vld [vmem:[#allocation7 + $0x6a0] sm:$0xff] }
 0x3d3   :  { %3224 = vmatpush1.bf16.msra.mxu0 %v3223_v3  ;;  %v2043_v3 = vld [vmem:[#allocation7 + $0x590] sm:$0xff] }
 0x3d4   :  { %3226 = vmatprep.subr.bf16.mxu0 %v3225_v4  ;;  %v2046_v4 = vld [vmem:[#allocation7 + $0x5a8] sm:$0xff]  ;;  %v3263_v6 = vpack.c.bf16 %v2043_v3, %v2041_v2  ;;  %v2084_v2 = vld [vmem:[#allocation7 + $0x6d8] sm:$0xff] }
 0x3d5   :  { %v3265_v7 = vpack.c.bf16 %v2048_v5, %v2046_v4  ;;  %v2081_v4 = vld [vmem:[#allocation7 + $0x6c0] sm:$0xff] }
 0x3d7   :  { %3228 = vmatpush1.bf16.msra.mxu0 %v3227_v9  ;;  %v2047_v9 = vld [vmem:[#allocation7 + $0x5b0] sm:$0xff] }
 0x3d8   :  { %3230 = vmatprep.subr.bf16.mxu0 %v3229_v10  ;;  %v2050_v10 = vld [vmem:[#allocation7 + $0x5c8] sm:$0xff]  ;;  %v3267_v12 = vpack.c.bf16 %v2047_v9, %v2045_v8  ;;  %v2088_v8 = vld [vmem:[#allocation7 + $0x6f8] sm:$0xff]  ;;  %v2479_v9 = vld [vmem:[%s4077_s7 + $0x80] sm:$0xff] }
 0x3d9   :  { %v3269_v13 = vpack.c.bf16 %v2052_v11, %v2050_v10  ;;  %v2480_v10 = vld [vmem:[%s4077_s7 + $0x88] sm:$0xff]  ;;  %v2463_v11 = vld [vmem:[%s4077_s7] sm:$0xff] }
 0x3db   :  { %3232 = vmatpush1.bf16.msra.mxu0 %v3231_v15  ;;  %v2051_v15 = vld [vmem:[#allocation7 + $0x5d0] sm:$0xff] }
 0x3dc   :  { %3234 = vmatprep.subr.bf16.mxu0 %v3233_v16  ;;  %v2054_v16 = vld [vmem:[#allocation7 + $0x5e8] sm:$0xff]  ;;  %v3271_v18 = vpack.c.bf16 %v2051_v15, %v2049_v14  ;;  %v2481_v14 = vld [vmem:[%s4077_s7 + $0x90] sm:$0xff]  ;;  %v2482_v15 = vld [vmem:[%s4077_s7 + $0x98] sm:$0xff] }
 0x3dd   :  { %v3273_v19 = vpack.c.bf16 %v2056_v17, %v2054_v16 }
 0x3df   :  { %3236 = vmatpush1.bf16.msra.mxu0 %v3235_v21  ;;  %v2055_v21 = vld [vmem:[#allocation7 + $0x5f0] sm:$0xff] }
 0x3e0   :  { %3238 = vmatprep.subr.bf16.mxu0 %v3237_v22  ;;  %v2058_v22 = vld [vmem:[#allocation7 + $0x608] sm:$0xff]  ;;  %v3275_v25 = vpack.c.bf16 %v2055_v21, %v2053_v20  ;;  %v2466_v20 = vld [vmem:[%s4077_s7 + $0x18] sm:$0xff]  ;;  %v2483_v21 = vld [vmem:[%s4077_s7 + $0xa0] sm:$0xff] }
 0x3e1   :  { %v3277_v26 = vpack.c.bf16 %v2060_v23, %v2058_v22  ;;  %v2085_v23 = vld [vmem:[#allocation7 + $0x6e0] sm:$0xff] }
 0x3e3   :  { %3240 = vmatpush1.bf16.msra.mxu0 %v3239_v57  ;;  %v2057_v57 = vld [vmem:[#allocation7 + $0x600] sm:$0xff] }
 0x3e4   :  { %3242 = vmatprep.subr.bf16.mxu0 %v3241_v28  ;;  %v2059_v28 = vld [vmem:[#allocation7 + $0x610] sm:$0xff] }
 0x3e5   :  { %v3279_v61 = vpack.c.bf16 %v2059_v28, %v2057_v57  ;;  %v2092_v57 = vld [vmem:[#allocation7 + $0x718] sm:$0xff] }
 0x3e7   :  { %3244 = vmatpush1.bf16.msra.mxu0 %v3243_v32  ;;  %v3281_v32 = vpack.c.bf16 %v2064_v31, %v2062_v30  ;;  %v2467_v31 = vld [vmem:[%s4077_s7 + $0x20] sm:$0xff] }
 0x3e8   :  { %3246 = vmatprep.subr.bf16.mxu0 %v3245_v33  ;;  %v2061_v33 = vld [vmem:[#allocation7 + $0x620] sm:$0xff] }
 0x3e9   :  { %v3283_v60 = vpack.c.bf16 %v2063_v56, %v2061_v33  ;;  %v2485_v33 = vld [vmem:[%s4077_s7 + $0xb0] sm:$0xff]  ;;  %v2486_v56 = vld [vmem:[%s4077_s7 + $0xb8] sm:$0xff] }
 0x3eb   :  { %3248 = vmatpush1.bf16.msra.mxu0 %v3247_v37  ;;  %v2065_v37 = vld [vmem:[#allocation7 + $0x640] sm:$0xff] }
 0x3ec   :  { %3250 = vmatprep.subr.bf16.mxu0 %v3249_v38  ;;  %v2067_v38 = vld [vmem:[#allocation7 + $0x650] sm:$0xff] }
 0x3ed   :  { %v3287_v41 = vpack.c.bf16 %v2067_v38, %v2065_v37  ;;  %v3353_v38 = vpack.c.bf16 %v2486_v56, %v2485_v33  ;;  %v2113_v33 = vld [vmem:[#allocation7 + $0x7c0] sm:$0xff]  ;;  %v2115_v56 = vld [vmem:[#allocation7 + $0x7d0] sm:$0xff] }
 0x3ef   :  { %3252 = vmatpush1.bf16.msra.mxu0 %v3251_v44  ;;  %v2069_v44 = vld [vmem:[#allocation7 + $0x660] sm:$0xff] }
 0x3f0   :  { %3254 = vmatprep.subr.bf16.mxu0 %v3253_v46  ;;  %v2071_v46 = vld [vmem:[#allocation7 + $0x670] sm:$0xff] }
 0x3f1   :  { %v3291_v49 = vpack.c.bf16 %v2071_v46, %v2069_v44  ;;  %v2488_v44 = vld [vmem:[%s4077_s7 + $0xc8] sm:$0xff] }
 0x3f3   :  { %3256 = vmatpush1.bf16.msra.mxu0 %v3255_v51  ;;  %v2075_v51 = vld [vmem:[#allocation7 + $0x690] sm:$0xff] }
 0x3f4   :  { %3258 = vmatprep.subr.bf16.mxu0 %v3257_v53  ;;  %v2078_v53 = vld [vmem:[#allocation7 + $0x6a8] sm:$0xff]  ;;  %v3295_v62 = vpack.c.bf16 %v2075_v51, %v2073_v50  ;;  %v3355_v50 = vpack.c.bf16 %v2470_v40, %v2469_v39  ;;  %v2475_v39 = vld [vmem:[%s4077_s7 + $0x60] sm:$0xff] }
 0x3f5   :  { %v3297_v63 = vpack.c.bf16 %v2080_v55, %v2078_v53  ;;  %v2471_v53 = vld [vmem:[%s4077_s7 + $0x40] sm:$0xff]  ;;  %v2472_v55 = vld [vmem:[%s4077_s7 + $0x48] sm:$0xff] }
 0x3f6   :  { %v2476_v40 = vld [vmem:[%s4077_s7 + $0x68] sm:$0xff] }
 0x3f7   :  { %3260 = vmatpush1.bf16.msra.mxu0 %v3259_v0  ;;  %v2079_v0 = vld [vmem:[#allocation7 + $0x6b0] sm:$0xff] }
 0x3f8   :  { %3262 = vmatprep.subr.bf16.mxu0 %v3261_v1  ;;  %v2082_v1 = vld [vmem:[#allocation7 + $0x6c8] sm:$0xff]  ;;  %v3299_v3 = vpack.c.bf16 %v2079_v0, %v2077_v58  ;;  %v2490_v58 = vld [vmem:[%s4077_s7 + $0xd8] sm:$0xff] }
 0x3f9   :  { %v3301_v5 = vpack.c.bf16 %v2084_v2, %v2082_v1  ;;  %v2097_v1 = vld [vmem:[#allocation7 + $0x740] sm:$0xff]  ;;  %v2099_v2 = vld [vmem:[#allocation7 + $0x750] sm:$0xff] }
 0x3fb   :  { %3264 = vmatpush1.bf16.msra.mxu0 %v3263_v6  ;;  %v2083_v6 = vld [vmem:[#allocation7 + $0x6d0] sm:$0xff] }
 0x3fc   :  { %3266 = vmatprep.subr.bf16.mxu0 %v3265_v7  ;;  %v2086_v7 = vld [vmem:[#allocation7 + $0x6e8] sm:$0xff]  ;;  %v3303_v16 = vpack.c.bf16 %v2083_v6, %v2081_v4  ;;  %v2104_v4 = vld [vmem:[#allocation7 + $0x778] sm:$0xff] }
 0x3fd   :  { %v3305_v22 = vpack.c.bf16 %v2088_v8, %v2086_v7  ;;  %v2473_v7 = vld [vmem:[%s4077_s7 + $0x50] sm:$0xff]  ;;  %v2474_v8 = vld [vmem:[%s4077_s7 + $0x58] sm:$0xff] }
 0x3ff   :  { %3268 = vmatpush1.bf16.msra.mxu0 %v3267_v12  ;;  %v3341_v12 = vpack.c.bf16 %v2480_v10, %v2479_v9  ;;  %v3319_v9 = vpack.c.bf16 %v2099_v2, %v2097_v1  ;;  %v2491_v10 = vld [vmem:[%s4077_s7 + $0xe0] sm:$0xff] }
 0x400   :  { %3270 = vmatprep.subr.bf16.mxu0 %v3269_v13  ;;  %v2464_v13 = vld [vmem:[%s4077_s7 + $0x8] sm:$0xff]  ;;  %v2573_v2 = vld [vmem:[%s4079_s9] sm:$0xff] }
 0x401   :  { %v3343_v17 = vpack.c.bf16 %v2464_v13, %v2463_v11  ;;  %3342 = vmatprep.subr.bf16.mxu1 %v3341_v12  ;;  %v2492_v11 = vld [vmem:[%s4077_s7 + $0xe8] sm:$0xff]  ;;  %v2101_v13 = vld [vmem:[#allocation7 + $0x760] sm:$0xff] }
 0x403   :  { %3272 = vmatpush1.bf16.msra.mxu0 %v3271_v18  ;;  %v3345_v18 = vpack.c.bf16 %v2482_v15, %v2481_v14  ;;  %3344 = vmatpush3.bf16.msra.mxu1 %v3343_v17  ;;  %v2103_v14 = vld [vmem:[#allocation7 + $0x770] sm:$0xff]  ;;  %v2106_v15 = vld [vmem:[#allocation7 + $0x788] sm:$0xff]  ;;  %v3363_v17 = vpack.c.bf16 %v2474_v8, %v2473_v7  ;;  %v2577_v8 = vld [vmem:[%s4079_s9 + $0x20] sm:$0xff] }
 0x404   :  { %3274 = vmatprep.subr.bf16.mxu0 %v3273_v19  ;;  %v2465_v19 = vld [vmem:[%s4077_s7 + $0x10] sm:$0xff] }
 0x405   :  { %v3347_v28 = vpack.c.bf16 %v2466_v20, %v2465_v19  ;;  %3346 = vmatprep.subr.bf16.mxu1 %v3345_v18  ;;  %v3365_v18 = vpack.c.bf16 %v2492_v11, %v2491_v10  ;;  %v3323_v19 = vpack.c.bf16 %v2103_v14, %v2101_v13  ;;  %v2579_v11 = vld [vmem:[%s4079_s9 + $0x30] sm:$0xff]  ;;  %v2581_v14 = vld [vmem:[%s4079_s9 + $0x40] sm:$0xff] }
 0x407   :  { %3276 = vmatpush1.bf16.msra.mxu0 %v3275_v25  ;;  %v2484_v25 = vld [vmem:[%s4077_s7 + $0xa8] sm:$0xff]  ;;  %3348 = vmatpush3.bf16.msra.mxu1 %v3347_v28  ;;  %v2111_v28 = vld [vmem:[#allocation7 + $0x7b0] sm:$0xff] }
 0x408   :  { %3278 = vmatprep.subr.bf16.mxu0 %v3277_v26  ;;  %v2090_v26 = vld [vmem:[#allocation7 + $0x708] sm:$0xff]  ;;  %v3349_v30 = vpack.c.bf16 %v2484_v25, %v2483_v21  ;;  %v2105_v21 = vld [vmem:[#allocation7 + $0x780] sm:$0xff] }
 0x40a   :  { %2384 = vmatmul.mubr.f32.vlgmr.msra.gmra.mrb[2].mxu0 %v3842_v45  ;;  %v3293_v45 = vpack.c.bf16 %v2076_v48, %v2074_v47  ;;  %3350 = vmatprep.subr.bf16.mxu1 %v3349_v30  ;;  %v2093_v47 = vld [vmem:[#allocation7 + $0x720] sm:$0xff]  ;;  %v2095_v48 = vld [vmem:[#allocation7 + $0x730] sm:$0xff]  ;;  %v2114_v30 = vld [vmem:[#allocation7 + $0x7c8] sm:$0xff] }
 0x40b   :  { %3280 = vmatpush1.bf16.msra.mxu0 %v3279_v61  ;;  %2454 = vmatprep.mubr.f32.mxu0 %v2168_v42  ;;  %v2468_v61 = vld [vmem:[%s4077_s7 + $0x28] sm:$0xff]  ;;  %v3309_v42 = vpack.c.bf16 %v2092_v57, %v2090_v26  ;;  %v2109_v57 = vld [vmem:[#allocation7 + $0x7a0] sm:$0xff] }
 0x40c   :  { %3282 = vmatprep.subr.bf16.mxu0 %v3281_v32  ;;  %v3307_v32 = vpack.c.bf16 %v2087_v24, %v2085_v23  ;;  %v3351_v37 = vpack.c.bf16 %v2468_v61, %v2467_v31  ;;  %v2110_v23 = vld [vmem:[#allocation7 + $0x7a8] sm:$0xff]  ;;  %v2112_v24 = vld [vmem:[#allocation7 + $0x7b8] sm:$0xff]  ;;  %v3331_v61 = vpack.c.bf16 %v2111_v28, %v2109_v57  ;;  %v2822_v57 = vld [vmem:[%s4078_s8] ss:$0 sm:$0xff] }
 0x40d   :  { %v3329_v26 = vpack.c.bf16 %v2112_v24, %v2110_v23  ;;  %v2116_v31 = vld [vmem:[#allocation7 + $0x7d8] sm:$0xff]  ;;  %v2587_v23 = vld [vmem:[%s4079_s9 + $0x70] sm:$0xff] }
 0x40e   :  { %3352 = vmatpush3.bf16.msra.mxu1 %v3351_v37  ;;  %v2119_v37 = vld [vmem:[#allocation7 + $0x7f0] sm:$0xff]  ;;  %v2588_v24 = vld [vmem:[%s4079_s9 + $0x78] sm:$0xff] }
 0x40f   :  { %3284 = vmatpush1.bf16.msra.mxu0 %v3283_v60  ;;  %v2094_v60 = vld [vmem:[#allocation7 + $0x728] sm:$0xff]  ;;  %3354 = vmatprep.subr.bf16.mxu1 %v3353_v38 }
 0x410   :  { %3286 = vmatprep.subr.bf16.mxu0 %v3285_v35  ;;  %v2096_v35 = vld [vmem:[#allocation7 + $0x738] sm:$0xff] }
 0x411   :  { %v3313_v46 = vpack.c.bf16 %v2096_v35, %v2094_v60  ;;  %v2117_v35 = vld [vmem:[#allocation7 + $0x7e0] sm:$0xff] }
 0x412   :  { %3356 = vmatpush3.bf16.msra.mxu1 %v3355_v50  ;;  %v3339_v38 = vpack.c.bf16 %v2119_v37, %v2117_v35  ;;  %v3570_v50 = vmov 0.0|0.0   ;;  %v2672_v35 = vld [vmem:[%s4081_s11 + $0x28] sm:$0xff] }
 0x413   :  { %3288 = vmatpush1.bf16.msra.mxu0 %v3287_v41  ;;  %v3311_v41 = vpack.c.bf16 %v2091_v36, %v2089_v34  ;;  %v2120_v34 = vld [vmem:[#allocation7 + $0x7f8] sm:$0xff]  ;;  %v3335_v36 = vpack.c.bf16 %v2115_v56, %v2113_v33 }
 0x414   :  { %3290 = vmatprep.subr.bf16.mxu0 %v3289_v43  ;;  %v2487_v43 = vld [vmem:[%s4077_s7 + $0xc0] sm:$0xff] }
 0x415   :  { %v3357_v51 = vpack.c.bf16 %v2488_v44, %v2487_v43  ;;  %v3367_v43 = vpack.c.bf16 %v2476_v40, %v2475_v39  ;;  %v2823_v40 = vld [vmem:[%s4080_s10] ss:$0 sm:$0xff]  ;;  %s3572_s10 = smov [#allocation9]  }
 0x417   :  { %3292 = vmatpush1.bf16.msra.mxu0 %v3291_v49  ;;  %v2098_v49 = vld [vmem:[#allocation7 + $0x748] sm:$0xff]  ;;  %3358 = vmatprep.subr.bf16.mxu1 %v3357_v51  ;;  %v2121_v51 = vld [vmem:[%s4076_s6] sm:$0x3] }
 0x418   :  { %3294 = vmatprep.subr.bf16.mxu0 %v3293_v45  ;;  %v2100_v45 = vld [vmem:[#allocation7 + $0x758] sm:$0xff] }
 0x419   :  { %v3317_v0 = vpack.c.bf16 %v2100_v45, %v2098_v49  ;;  %v2478_v49 = vld [vmem:[%s4077_s7 + $0x78] sm:$0xff] }
 0x41b   :  { %3296 = vmatpush1.bf16.msra.mxu0 %v3295_v62  ;;  %v3315_v62 = vpack.c.bf16 %v2095_v48, %v2093_v47  ;;  %v2477_v48 = vld [vmem:[%s4077_s7 + $0x70] sm:$0xff] }
 0x41c   :  { %3298 = vmatprep.subr.bf16.mxu0 %v3297_v63  ;;  %v2489_v63 = vld [vmem:[%s4077_s7 + $0xd0] sm:$0xff]  ;;  %v3371_v45 = vpack.c.bf16 %v2478_v49, %v2477_v48 }
 0x41d   :  { %v3361_v6 = vpack.c.bf16 %v2490_v58, %v2489_v63 }
 0x41f   :  { %3300 = vmatpush1.bf16.msra.mxu0 %v3299_v3  ;;  %v2102_v3 = vld [vmem:[#allocation7 + $0x768] sm:$0xff] }
 0x420   :  { %3302 = vmatprep.subr.bf16.mxu0 %v3301_v5  ;;  %v3359_v5 = vpack.c.bf16 %v2472_v55, %v2471_v53  ;;  %v3321_v12 = vpack.c.bf16 %v2104_v4, %v2102_v3  ;;  %v2126_v53 = vrot.slane %v2121_v51, %v1743_v52  ;;  %v2130_v55 = vrot.slane %v2121_v51, %v1747_v54  ;;  %v2574_v3 = vld [vmem:[%s4079_s9 + $0x8] sm:$0xff]  ;;  %v2576_v54 = vld [vmem:[%s4079_s9 + $0x18] sm:$0xff] }
 0x421   :  { %v3377_v7 = vpack.c.bf16 %v2576_v54, %v2575_v59 }
 0x422   :  { %3360 = vmatpush3.bf16.msra.mxu1 %v3359_v5 }
 0x423   :  { %3304 = vmatpush1.bf16.msra.mxu0 %v3303_v16  ;;  %v2108_v16 = vld [vmem:[#allocation7 + $0x798] sm:$0xff]  ;;  %3362 = vmatprep.subr.bf16.mxu1 %v3361_v6  ;;  %v3374_v6 = vpack.c.bf16 %v2574_v3, %v2573_v2 }
 0x424   :  { %3306 = vmatprep.subr.bf16.mxu0 %v3305_v22  ;;  %v3325_v20 = vpack.c.bf16 %v2108_v16, %v2106_v15  ;;  %v2107_v22 = vld [vmem:[#allocation7 + $0x790] sm:$0xff]  ;;  %v2582_v15 = vld [vmem:[%s4079_s9 + $0x48] sm:$0xff] }
 0x425   :  { %v3327_v25 = vpack.c.bf16 %v2107_v22, %v2105_v21  ;;  %v3386_v16 = vpack.c.bf16 %v2582_v15, %v2581_v14  ;;  %v2586_v21 = vld [vmem:[%s4079_s9 + $0x68] sm:$0xff] }
 0x426   :  { %3364 = vmatpush3.bf16.msra.mxu1 %v3363_v17  ;;  %v2583_v17 = vld [vmem:[%s4079_s9 + $0x50] sm:$0xff] }
 0x427   :  { %3308 = vmatpush1.bf16.msra.mxu0 %v3307_v32  ;;  %3366 = vmatprep.subr.bf16.mxu1 %v3365_v18  ;;  %v3333_v32 = vpack.c.bf16 %v2116_v31, %v2114_v30  ;;  %v2584_v18 = vld [vmem:[%s4079_s9 + $0x58] sm:$0xff]  ;;  %v2667_v31 = vld [vmem:[%s4081_s11] sm:$0xff] }
 0x428   :  { %3310 = vmatprep.subr.bf16.mxu0 %v3309_v42  ;;  %v2118_v42 = vld [vmem:[#allocation7 + $0x7e8] sm:$0xff] }
 0x429   :  { %v3337_v60 = vpack.c.bf16 %v2120_v34, %v2118_v42  ;;  %v2669_v42 = vld [vmem:[%s4081_s11 + $0x10] sm:$0xff]  ;;  %v2670_v34 = vld [vmem:[%s4081_s11 + $0x18] sm:$0xff] }
 0x42a   :  { %3368 = vmatpush3.bf16.msra.mxu1 %v3367_v43 }
 0x42b   :  { %3312 = vmatpush1.bf16.msra.mxu0 %v3311_v41 }
 0x42c   :  { %3314 = vmatprep.subr.bf16.mxu0 %v3313_v46  ;;  %v2493_v46 = vld [vmem:[%s4077_s7 + $0xf0] sm:$0xff] }
 0x42f   :  { %3316 = vmatpush1.bf16.msra.mxu0 %v3315_v62 }
 0x430   :  { %3318 = vmatprep.subr.bf16.mxu0 %v3317_v0 }
 0x433   :  { %3320 = vmatpush1.bf16.msra.mxu0 %v3319_v9  ;;  %v2578_v9 = vld [vmem:[%s4079_s9 + $0x28] sm:$0xff] }
 0x434   :  { %3322 = vmatprep.subr.bf16.mxu0 %v3321_v12  ;;  %v3380_v10 = vpack.c.bf16 %v2578_v9, %v2577_v8  ;;  %v2580_v12 = vld [vmem:[%s4079_s9 + $0x38] sm:$0xff] }
 0x435   :  { %v3383_v13 = vpack.c.bf16 %v2580_v12, %v2579_v11 }
 0x437   :  { %3324 = vmatpush1.bf16.msra.mxu0 %v3323_v19  ;;  %v3389_v19 = vpack.c.bf16 %v2584_v18, %v2583_v17 }
 0x438   :  { %3326 = vmatprep.subr.bf16.mxu0 %v3325_v20  ;;  %v2585_v20 = vld [vmem:[%s4079_s9 + $0x60] sm:$0xff] }
 0x439   :  { %v3392_v22 = vpack.c.bf16 %v2586_v21, %v2585_v20 }
 0x43b   :  { %3328 = vmatpush1.bf16.msra.mxu0 %v3327_v25  ;;  %v3395_v25 = vpack.c.bf16 %v2588_v24, %v2587_v23 }
 0x43c   :  { %3330 = vmatprep.subr.bf16.mxu0 %v3329_v26 }
 0x43f   :  { %3332 = vmatpush1.bf16.msra.mxu0 %v3331_v61  ;;  %v2668_v61 = vld [vmem:[%s4081_s11 + $0x8] sm:$0xff] }
 0x440   :  { %3334 = vmatprep.subr.bf16.mxu0 %v3333_v32  ;;  %v3398_v33 = vpack.c.bf16 %v2668_v61, %v2667_v31 }
 0x443   :  { %3336 = vmatpush1.bf16.msra.mxu0 %v3335_v36  ;;  %v3401_v36 = vpack.c.bf16 %v2670_v34, %v2669_v42 }
 0x444   :  { %3338 = vmatprep.subr.bf16.mxu0 %v3337_v60  ;;  %v2671_v60 = vld [vmem:[%s4081_s11 + $0x20] sm:$0xff] }
 0x445   :  { %v3404_v37 = vpack.c.bf16 %v2672_v35, %v2671_v60 }
 0x447   :  { %3340 = vmatpush1.bf16.msra.mxu0 %v3339_v38  ;;  %v2674_v38 = vld [vmem:[%s4081_s11 + $0x38] sm:$0xff] }
 0x44a   :  { %2455 = vmatmul.mubr.f32.vlgmr.msra.gmra.mrb[2].mxu0 %v3849_v29  ;;  %v2494_v29 = vld [vmem:[%s4077_s7 + $0xf8] sm:$0xff] }
 0x44b   :  { %v3369_v47 = vpack.c.bf16 %v2494_v29, %v2493_v46  ;;  %v2824_v29 = vld [vmem:[%s4082_s12] ss:$0 sm:$0xff] }
 0x44d   :  { %3370 = vmatprep.subr.bf16.mxu1 %v3369_v47 }
 0x44e   :  { %3372 = vmatpush3.bf16.msra.mxu1 %v3371_v45 }
 0x44f   :  { %3373 = vmatprep.subr.bf16.mxu1 %v3570_v50 }
 0x49b   :  { %v2243_v41 = vpop.f32.mrb[6].mxu1 }
 0x49c   :  { %v2245_v44 = vpop.f32.mrb[7].mxu1  ;;  %v2244_v62 = vadd.f32 %v2243_v41, %v2126_v53 }
 0x49d   :  { %v2246_v63 = vadd.f32 %v2245_v44, %v2130_v55 }
 0x51d   :  { %v2456_v58 = vpop.f32.mrb[2].mxu0 }
 0x51e   :  { %v3412_v0 = vadd.f32 %v2456_v58, %v2244_v62  ;;  %v2458_v1 = vpop.f32.mrb[3].mxu0 }
 0x51f   :  { %v3414_v4 = vadd.f32 %v2458_v1, %v2246_v63 }
 0x520   :  { %v2461_v52 = vmax.f32 %v3412_v0, 0.0 }
 0x521   :  { %v2462_v5 = vmax.f32 %v3414_v4, 0.0 }
 0x523   :  { %2566 = vmatprep.mubr.f32.mxu1 %v2462_v5 }
 0x524   :  { %2567 = vmatmul.mubr.f32.vlgmr.msra.gmra.mrb[8].mxu1 %v2461_v52 }
 0x525   :  { %3375 = vmatpush3.bf16.msra.mxu1 %v3374_v6  ;;  %2991 = vmatprep.mubr.msk.f32.mxu1 %vm3571_vm8, %v3564_v27 }
 0x526   :  { %3376 = vmatprep.subr.bf16.mxu1 %v3570_v50 }
 0x529   :  { %3378 = vmatpush3.bf16.msra.mxu1 %v3377_v7 }
 0x52a   :  { %3379 = vmatprep.subr.bf16.mxu1 %v3570_v50 }
 0x52d   :  { %3381 = vmatpush3.bf16.msra.mxu1 %v3380_v10 }
 0x52e   :  { %3382 = vmatprep.subr.bf16.mxu1 %v3570_v50 }
 0x531   :  { %3384 = vmatpush3.bf16.msra.mxu1 %v3383_v13 }
 0x532   :  { %3385 = vmatprep.subr.bf16.mxu1 %v3570_v50 }
 0x535   :  { %3387 = vmatpush3.bf16.msra.mxu1 %v3386_v16 }
 0x536   :  { %3388 = vmatprep.subr.bf16.mxu1 %v3570_v50 }
 0x539   :  { %3390 = vmatpush3.bf16.msra.mxu1 %v3389_v19 }
 0x53a   :  { %3391 = vmatprep.subr.bf16.mxu1 %v3570_v50 }
 0x53d   :  { %3393 = vmatpush3.bf16.msra.mxu1 %v3392_v22 }
 0x53e   :  { %3394 = vmatprep.subr.bf16.mxu1 %v3570_v50 }
 0x541   :  { %3396 = vmatpush3.bf16.msra.mxu1 %v3395_v25 }
 0x542   :  { %3397 = vmatprep.subr.bf16.mxu1 %v3570_v50 }
 0x5f7   :  { %v2885_v26 = vpop.f32.mrb[8].mxu1 }
 0x5f8   :  { %v2886_v28 = vpop.f32.mrb[9].mxu1 }
 0x5f9   :  { %v2887_v30 = vadd.f32 %v2886_v28, %v2885_v26 }
 0x5fb   :  { %v2569_v32 = vadd.f32 %v2887_v30, %v2822_v57 }
 0x5fd   :  { %v2572_v56 = vmax.f32 %v2569_v32, 0.0 }
 0x5ff   :  { %2992 = vmatmul.mubr.f32.vlgmr.msra.gmra.mrb[10].mxu1 %v2572_v56 }
 0x600   :  { %3399 = vmatpush3.bf16.msra.mxu1 %v3398_v33  ;;  %3010 = vmatprep.mubr.msk.f32.mxu1 %vm3571_vm8, %v3564_v27  ;;  %v2673_v27 = vld [vmem:[%s4081_s11 + $0x30] sm:$0xff]  ;;  %s2775_s11 = sshll.u32 %s3572_s10, 4  ;;  %s2776_s11 = int_to_ptr.vmem [resolvable:$true] %s2775_s11 }
 0x601   :  { %3400 = vmatprep.subr.bf16.mxu1 %v3570_v50  ;;  %v3407_v39 = vpack.c.bf16 %v2674_v38, %v2673_v27  ;;  %s3530_s12 = scalar_lea.vmem %s2776_s11, 32  ;;  %p3535_p3 = scmp.lt.s32.totalorder %s2776_s11, %s2776_s11 }
 0x602   :  { %p3531_p2 = scmp.ne.s32.totalorder %s2776_s11, %s3530_s12  ;;  %p3536_p4 = scmp.lt.s32.totalorder %s3530_s12, %s3530_s12 }
 0x604   :  { %3402 = vmatpush3.bf16.msra.mxu1 %v3401_v36  ;;  %p3537_p5 = por %p3536_p4, %p3535_p3 }
 0x605   :  { %3403 = vmatprep.subr.bf16.mxu1 %v3570_v50 }
 0x606   :  { %p3538_p6 = pnand %p3537_p5, %p3531_p2 }
 0x608   :  { %3405 = vmatpush3.bf16.msra.mxu1 %v3404_v37 }
 0x609   :  { %3406 = vmatprep.subr.bf16.mxu1 %v3570_v50 }
 0x60c   :  { %3408 = vmatpush3.bf16.msra.mxu1 %v3407_v39 }
 0x6d2   :  { %v2662_v41 = vpop.f32.mrb[10].mxu1 }
 0x6d3   :  { %v2663_v43 = vadd.f32 %v2823_v40, %v2662_v41  ;;  %v2993_v44 = vpop.f32.mrb[11].mxu1 }
 0x6d5   :  { %v2666_v46 = vmax.f32 %v2663_v43, 0.0 }
 0x6d7   :  { %3011 = vmatmul.mubr.msk.f32.vlgmr.msra.gmra.mrb[12].mxu1 %vm2682_vm9, %v2666_v46 }
 0x7aa   :  { %v2752_v47 = vpop.f32.mrb[12].mxu1 }
 0x7ab   :  { %v2753_v48 = vadd.f32 %v2824_v29, %v2752_v47  ;;  %v3012_v49 = vpop.f32.mrb[13].mxu1 }
 0x7ad   :  { %v2757_v45 = vsel %vm2756_vm10, %v2753_v48, -inf }
 0x7ae   :  { %2758 = vmax.xlane.f32.xlu0 %v2757_v45 }
 0x83b   :  { %v2759_v50 = vpop.xlane.xlu0 %2758 }
 0x83c   :  { %v2760_v51 = vsub.f32 %v2753_v48, %v2759_v50 }
 0x83e   :  { %v2761_v53 = vmul.f32 1.442695, %v2760_v51 }
 0x840   :  { %3482 = vpow2.f32 %v2761_v53 }
 0x84a   :  { %v3483_v55 = vpop.eup %3482 }
 0x84b   :  { %v2763_v62 = vsel %vm2756_vm10, %v3483_v55, 0.0 }
 0x84c   :  { %2764 = vadd.xlane.f32.xlu1 %v2763_v62 }
 0x8d9   :  { %v2765_v63 = vpop.xlane.xlu1 %2764 }
 0x8da   :  { %3484 = vrcp.f32 %v2765_v63 }
 0x8e4   :  { %v3485_v58 = vpop.eup %3484 }
 0x8e5   :  { %v2767_v0 = vmul.f32 %v3485_v58, %v3483_v55 }
 0x8e7   :  { %2768 = vst.msk [vmem:[#allocation9] sm:$0x3] %vm2756_vm10, %v2767_v0 }
 0x8e8   :  { %3541 = shalt.err (!%p3538_p6)
}
 0x8e9   :  { %s3542_s6 = scalar_lea.hbm %s4083_s13, 32 }
 0x8ea   :  { %p3543_p7 = scmp.ne.s32.totalorder %s4083_s13, %s3542_s6  ;;  %p3546_p8 = scmp.lt.u32.totalorder %s3542_s6, %s4083_s13 }
 0x8ec   :  { %p3548_p9 = pnand %p3546_p8, %p3543_p7 }
 0x8ee   :  { %3551 = shalt.err (!%p3548_p9)
}
 0x8ef   :  { %2778 = dma.vmem_to_hbm [thread:$0]  %s2776_s11, 32, %s4083_s13, [#allocation6]  }
 0x8f0   :  { %3556 = dma.done.wait [#allocation6], 32  }
 0x8f1   :  { %3557 = vsyncadd [#allocation6], 4294967264 }
 0x8f2   :  { %2782 = vsyncpa [#allocation5], 1 }
 0x8f3   :  { %2783 = vsyncpa [#allocation8], 1 }
 0x8f4   :  { %2784 = vsyncpa [#allocation6], 1 }

</bundles_post_ra>
